<compile_context>
chip_gen: v7x
topology: tpu7x:2x2x1
jax: 0.10.0
libtpu: 0.0.40
codegen_flags: <defaults>
</compile_context>

<pallas_src>
import jax
import jax.numpy as jnp
from jax import lax
from jax.experimental import pallas as pl
from jax.experimental.pallas import tpu as pltpu


# --------------------------------------------------------------------------
# Fused ST_BLOCK_0 kernel (one batch element per grid step).
# --------------------------------------------------------------------------
def _make_st_block_kernel(c_in, c_out, N, T, K):
    def kernel(w1t_ref, w1s_ref,                      # SMEM scalar vectors
               x_ref, adj_ref,
               w2t_ref, t_w_ref, t_b_ref, t_v_ref,    # TATT weights
               w2s_ref, s_w_ref, s_b_ref, s_v_ref,    # SATT weights
               gk_ref, gb_ref,                        # GCN 1x1 conv (kron form)
               kt_ref, kc_ref, bias_ref,              # time conv + residual (kron form)
               gam_ref, bet_ref,                      # LayerNorm affine (re-laid-out)
               out_ref, s_out_ref, t_out_ref):
        f32 = jnp.float32

        xs = [x_ref[0, c] for c in range(c_in)]                 # c_in x (N, T)
        Xct = jnp.concatenate(xs, axis=1)                        # (N, c_in*T)

        # ------------------------------ TATT ------------------------------
        tmp_t = w1t_ref[0] * xs[0]
        for c in range(1, c_in):
            tmp_t = tmp_t + w1t_ref[c] * xs[c]                   # (N, T)
        f1_t = tmp_t.T                                           # (T, N)
        A_t = jnp.dot(f1_t, t_w_ref[...], preferred_element_type=f32)       # (T, c_in)
        F2t = jnp.concatenate(
            [jnp.dot(w2t_ref[...], xs[c], preferred_element_type=f32)
             for c in range(c_in)], axis=0)                      # (c_in, T)
        s_t = jnp.dot(A_t, F2t, preferred_element_type=f32) + t_b_ref[...]
        lg = 1.0 / (1.0 + jnp.exp(-s_t))                         # sigmoid
        lg = jnp.dot(t_v_ref[...], lg, preferred_element_type=f32)
        lg = lg - jnp.max(lg, axis=0, keepdims=True)             # torch.max(dim=1) shift
        lg = lg - jnp.max(lg, axis=1, keepdims=True)             # stable softmax
        e = jnp.exp(lg)
        t_coefs = e / jnp.sum(e, axis=1, keepdims=True)          # (T, T)
        T_coef = t_coefs.T                                       # transposed, as returned
        t_out_ref[0] = T_coef

        # ------------------------------ SATT ------------------------------
        f1_s = w1s_ref[0] * xs[0]
        for c in range(1, c_in):
            f1_s = f1_s + w1s_ref[c] * xs[c]                     # (N, T)
        B_s = jnp.dot(f1_s, s_w_ref[...], preferred_element_type=f32)       # (N, c_in)
        F2sT = jnp.dot(Xct, w2s_ref[...], preferred_element_type=f32)       # (N, c_in)
        s_s = jnp.dot(B_s, F2sT.T, preferred_element_type=f32) + s_b_ref[...]
        lgs = 1.0 / (1.0 + jnp.exp(-s_s))
        lgs = jnp.dot(s_v_ref[...], lgs, preferred_element_type=f32)
        lgs = lgs - jnp.max(lgs, axis=0, keepdims=True)
        lgs = lgs - jnp.max(lgs, axis=1, keepdims=True)
        es = jnp.exp(lgs)
        S_coef = es / jnp.sum(es, axis=1, keepdims=True)         # (N, N)
        s_out_ref[0] = S_coef

        # ---------- temporal apply + dynamic Chebyshev GCN + 1x1 conv + ReLU ----------
        # x_TAt[c] = x[c] @ T_coef, lane-concatenated -> (N, c_in*T)
        Xtat = jnp.concatenate(
            [jnp.dot(xs[c], T_coef, preferred_element_type=f32)
             for c in range(c_in)], axis=1)

        row = lax.broadcasted_iota(jnp.int32, (N, N), 0)
        col = lax.broadcasted_iota(jnp.int32, (N, N), 1)
        eye = (row == col).astype(f32)
        adj = adj_ref[...]

        # k = 0: (S_coef * I) @ Xtat == diag(S_coef) * Xtat   (no matmul needed)
        ds_diag = jnp.sum(S_coef * eye, axis=1, keepdims=True)   # (N, 1)
        acc = jnp.dot(ds_diag * Xtat, gk_ref[0], preferred_element_type=f32)  # (N, c_out*T)

        t_pp, t_p = eye, adj
        for k in range(1, K):
            if k == 1:
                tk = adj
            else:
                tk = 2.0 * jnp.dot(adj, t_p, preferred_element_type=f32) - t_pp
                t_pp, t_p = t_p, tk
            zk = jnp.dot(S_coef * tk, Xtat, preferred_element_type=f32)      # (N, c_in*T)
            acc = acc + jnp.dot(zk, gk_ref[k], preferred_element_type=f32)   # (N, c_out*T)
        G = jnp.maximum(acc + gb_ref[...], 0.0)                  # ReLU(spatial_gcn)

        # ---------- time conv (shift folded into kron weights) + residual + ReLU + LN ----------
        H = jnp.dot(G, kt_ref[...], preferred_element_type=f32)              # time conv
        H = H + jnp.dot(Xct, kc_ref[...], preferred_element_type=f32)        # residual 1x1 conv
        H = jnp.maximum(H + bias_ref[...], 0.0)                  # ReLU

        denom = float(c_out * N * T)
        mean = jnp.sum(H) / denom
        cen = H - mean
        var = jnp.sum(cen * cen) / denom
        inv = lax.rsqrt(var + 1e-5)
        out_ref[0] = cen * inv * gam_ref[...] + bet_ref[...]     # (N, c_out*T)

    return kernel


# --------------------------------------------------------------------------
# Parameters (deterministic, synthetic) and the full forward pass.
# --------------------------------------------------------------------------
def init_params(key, c_in, c_out, N, T, K, Kt):
    ks = jax.random.split(key, 11)

    def rnd(k, shape, scale=0.1):
        return scale * jax.random.normal(k, shape, dtype=jnp.float32)

    return dict(
        # TATT
        t_conv1_w=rnd(ks[0], (c_in,)),
        t_conv2_w=rnd(ks[1], (N,)),
        t_w=rnd(ks[2], (N, c_in)),
        t_b=jnp.zeros((T, T), jnp.float32),
        t_v=rnd(ks[3], (T, T)),
        # SATT
        s_conv1_w=rnd(ks[4], (c_in,)),
        s_conv2_w=rnd(ks[5], (T,)),
        s_w=rnd(ks[6], (T, c_in)),
        s_b=jnp.zeros((N, N), jnp.float32),
        s_v=rnd(ks[7], (N, N)),
        # dynamic_gcn 1x1 conv (input channels = K * c_in, index = c*K + k)
        g_w=rnd(ks[8], (c_out, K * c_in)),
        g_b=jnp.zeros((c_out,), jnp.float32),
        # residual 1x1 conv
        c1_w=rnd(ks[9], (c_out, c_in)),
        c1_b=jnp.zeros((c_out,), jnp.float32),
        # time conv (1, Kt)
        tc_w=rnd(ks[10], (c_out, c_out, Kt)),
        tc_b=jnp.zeros((c_out,), jnp.float32),
        # LayerNorm([c_out, N, T]) default affine init
        ln_gamma=jnp.ones((c_out, N, T), jnp.float32),
        ln_beta=jnp.zeros((c_out, N, T), jnp.float32),
    )


def st_block_0_forward(x, supports, params, K, Kt, c_out):
    B, c_in, N, T = x.shape
    assert Kt == 3, "time_conv with padding=(0,1) only preserves T when Kt == 3"
    f32 = jnp.float32
    CT = c_out * T
    eyeT = jnp.eye(T, dtype=f32)

    # --- parameter-side re-packing only (activations never leave the kernel) ---
    # GCN 1x1 conv: out[n, o*T+t] = sum_{c,k} g_w[o, c*K+k] * Zk[n, c*T+t]
    GK = jnp.stack([jnp.kron(params['g_w'][:, k::K].T, eyeT) for k in range(K)])   # (K, c_in*T, CT)
    gb_row = jnp.repeat(params['g_b'], T)[None, :]                                  # (1, CT)
    # Time conv with zero padding: shift folded into kron(weight, shifted-identity)
    KT_all = sum(jnp.kron(params['tc_w'][:, :, dt].T, jnp.eye(T, k=1 - dt, dtype=f32))
                 for dt in range(Kt))                                               # (CT, CT)
    # Residual 1x1 conv on raw x
    KC = jnp.kron(params['c1_w'].T, eyeT)                                           # (c_in*T, CT)
    bias_row = jnp.repeat(params['tc_b'] + params['c1_b'], T)[None, :]              # (1, CT)
    # LayerNorm affine in (N, c_out*T) layout
    gamma_l = jnp.transpose(params['ln_gamma'], (1, 0, 2)).reshape(N, CT)
    beta_l = jnp.transpose(params['ln_beta'], (1, 0, 2)).reshape(N, CT)
    # Attention helper weights
    w2t_row = params['t_conv2_w'][None, :]                                          # (1, N)
    w2s_blk = jnp.kron(jnp.eye(c_in, dtype=f32), params['s_conv2_w'][:, None])      # (c_in*T, c_in)

    kernel = _make_st_block_kernel(c_in, c_out, N, T, K)
    const2 = lambda b: (0, 0)
    const3 = lambda b: (0, 0, 0)

    out_l, S_coef, T_coef = pl.pallas_call(
        kernel,
        out_shape=(jax.ShapeDtypeStruct((B, N, CT), f32),
                   jax.ShapeDtypeStruct((B, N, N), f32),
                   jax.ShapeDtypeStruct((B, T, T), f32)),
        grid=(B,),
        in_specs=[
            pl.BlockSpec(memory_space=pltpu.MemorySpace.SMEM),          # t_conv1_w (c_in,)
            pl.BlockSpec(memory_space=pltpu.MemorySpace.SMEM),          # s_conv1_w (c_in,)
            pl.BlockSpec((1, c_in, N, T), lambda b: (b, 0, 0, 0)),      # x
            pl.BlockSpec((N, N), const2),                               # supports (adj)
            pl.BlockSpec((1, N), const2),                               # w2t_row
            pl.BlockSpec((N, c_in), const2),                            # t_w
            pl.BlockSpec((T, T), const2),                               # t_b
            pl.BlockSpec((T, T), const2),                               # t_v
            pl.BlockSpec((c_in * T, c_in), const2),                     # w2s_blk
            pl.BlockSpec((T, c_in), const2),                            # s_w
            pl.BlockSpec((N, N), const2),                               # s_b
            pl.BlockSpec((N, N), const2),                               # s_v
            pl.BlockSpec((K, c_in * T, CT), const3),                    # GK
            pl.BlockSpec((1, CT), const2),                              # gb_row
            pl.BlockSpec((CT, CT), const2),                             # KT_all
            pl.BlockSpec((c_in * T, CT), const2),                       # KC
            pl.BlockSpec((1, CT), const2),                              # bias_row
            pl.BlockSpec((N, CT), const2),                              # gamma_l
            pl.BlockSpec((N, CT), const2),                              # beta_l
        ],
        out_specs=(pl.BlockSpec((1, N, CT), lambda b: (b, 0, 0)),
                   pl.BlockSpec((1, N, N), lambda b: (b, 0, 0)),
                   pl.BlockSpec((1, T, T), lambda b: (b, 0, 0))),
        compiler_params=pltpu.CompilerParams(dimension_semantics=("parallel",)),
    )(params['t_conv1_w'], params['s_conv1_w'],
      x, supports, w2t_row, params['t_w'], params['t_b'], params['t_v'],
      w2s_blk, params['s_w'], params['s_b'], params['s_v'],
      GK, gb_row, KT_all, KC, bias_row, gamma_l, beta_l)

    # lane-dense kernel output (B, N, c_out*T) -> PyTorch layout (B, c_out, N, T)
    out = jnp.transpose(out_l.reshape(B, N, c_out, T), (0, 2, 1, 3))
    return out, S_coef, T_coef


if __name__ == "__main__":
    B, c_in, c_out, N, T, K, Kt = 2, 4, 8, 16, 16, 3, 3
    key = jax.random.PRNGKey(0)
    kx, ka, kp = jax.random.split(key, 3)
    x = jax.random.normal(kx, (B, c_in, N, T), dtype=jnp.float32)
    supports = jax.random.uniform(ka, (N, N), dtype=jnp.float32)
    params = init_params(kp, c_in, c_out, N, T, K, Kt)

    forward = jax.jit(st_block_0_forward, static_argnames=("K", "Kt", "c_out"))
    out, S_coef, T_coef = forward(x, supports, params, K=K, Kt=Kt, c_out=c_out)
    jax.block_until_ready((out, S_coef, T_coef))
    assert out.shape == (B, c_out, N, T)
    assert S_coef.shape == (B, N, N) and T_coef.shape == (B, T, T)
    print("KERNEL_OK")
</pallas_src>

<mosaic_0001>
module attributes {stable_mosaic.version = 11 : i64} {
  func.func @kernel(%arg0: i32, %arg1: memref<4xf32, #tpu.memory_space<smem>>, %arg2: memref<4xf32, #tpu.memory_space<smem>>, %arg3: memref<1x4x16x16xf32, #tpu.memory_space<vmem>>, %arg4: memref<16x16xf32, #tpu.memory_space<vmem>>, %arg5: memref<1x16xf32, #tpu.memory_space<vmem>>, %arg6: memref<16x4xf32, #tpu.memory_space<vmem>>, %arg7: memref<16x16xf32, #tpu.memory_space<vmem>>, %arg8: memref<16x16xf32, #tpu.memory_space<vmem>>, %arg9: memref<64x4xf32, #tpu.memory_space<vmem>>, %arg10: memref<16x4xf32, #tpu.memory_space<vmem>>, %arg11: memref<16x16xf32, #tpu.memory_space<vmem>>, %arg12: memref<16x16xf32, #tpu.memory_space<vmem>>, %arg13: memref<3x64x128xf32, #tpu.memory_space<vmem>>, %arg14: memref<1x128xf32, #tpu.memory_space<vmem>>, %arg15: memref<128x128xf32, #tpu.memory_space<vmem>>, %arg16: memref<64x128xf32, #tpu.memory_space<vmem>>, %arg17: memref<1x128xf32, #tpu.memory_space<vmem>>, %arg18: memref<16x128xf32, #tpu.memory_space<vmem>>, %arg19: memref<16x128xf32, #tpu.memory_space<vmem>>, %arg20: memref<1x16x128xf32, #tpu.memory_space<vmem>>, %arg21: memref<1x16x16xf32, #tpu.memory_space<vmem>>, %arg22: memref<1x16x16xf32, #tpu.memory_space<vmem>>) attributes {dimension_semantics = [#tpu.dimension_semantics<parallel>], iteration_bounds = array<i64: 2>, scalar_prefetch = 0 : i64, scratch_operands = 0 : i64, tpu.core_type = #tpu.core_type<tc>, window_params = [{transform_indices = @transform_0, window_bounds = array<i64: 4>}, {transform_indices = @transform_1, window_bounds = array<i64: 4>}, {transform_indices = @transform_2, window_bounds = array<i64: 1, 4, 16, 16>}, {pipeline_mode = #tpu.pipeline_mode<synchronous>, transform_indices = @transform_3, window_bounds = array<i64: 16, 16>}, {pipeline_mode = #tpu.pipeline_mode<synchronous>, transform_indices = @transform_4, window_bounds = array<i64: 1, 16>}, {pipeline_mode = #tpu.pipeline_mode<synchronous>, transform_indices = @transform_5, window_bounds = array<i64: 16, 4>}, {pipeline_mode = #tpu.pipeline_mode<synchronous>, transform_indices = @transform_6, window_bounds = array<i64: 16, 16>}, {pipeline_mode = #tpu.pipeline_mode<synchronous>, transform_indices = @transform_7, window_bounds = array<i64: 16, 16>}, {pipeline_mode = #tpu.pipeline_mode<synchronous>, transform_indices = @transform_8, window_bounds = array<i64: 64, 4>}, {pipeline_mode = #tpu.pipeline_mode<synchronous>, transform_indices = @transform_9, window_bounds = array<i64: 16, 4>}, {pipeline_mode = #tpu.pipeline_mode<synchronous>, transform_indices = @transform_10, window_bounds = array<i64: 16, 16>}, {pipeline_mode = #tpu.pipeline_mode<synchronous>, transform_indices = @transform_11, window_bounds = array<i64: 16, 16>}, {pipeline_mode = #tpu.pipeline_mode<synchronous>, transform_indices = @transform_12, window_bounds = array<i64: 3, 64, 128>}, {pipeline_mode = #tpu.pipeline_mode<synchronous>, transform_indices = @transform_13, window_bounds = array<i64: 1, 128>}, {pipeline_mode = #tpu.pipeline_mode<synchronous>, transform_indices = @transform_14, window_bounds = array<i64: 128, 128>}, {pipeline_mode = #tpu.pipeline_mode<synchronous>, transform_indices = @transform_15, window_bounds = array<i64: 64, 128>}, {pipeline_mode = #tpu.pipeline_mode<synchronous>, transform_indices = @transform_16, window_bounds = array<i64: 1, 128>}, {pipeline_mode = #tpu.pipeline_mode<synchronous>, transform_indices = @transform_17, window_bounds = array<i64: 16, 128>}, {pipeline_mode = #tpu.pipeline_mode<synchronous>, transform_indices = @transform_18, window_bounds = array<i64: 16, 128>}, {transform_indices = @transform_19, window_bounds = array<i64: 1, 16, 128>}, {transform_indices = @transform_20, window_bounds = array<i64: 1, 16, 16>}, {transform_indices = @transform_21, window_bounds = array<i64: 1, 16, 16>}]} {
    %c0 = arith.constant 0 : index
    %c0_0 = arith.constant 0 : index
    %c0_1 = arith.constant 0 : index
    %c0_2 = arith.constant 0 : index
    %0 = vector.load %arg3[%c0, %c0_0, %c0_1, %c0_2] : memref<1x4x16x16xf32, #tpu.memory_space<vmem>>, vector<1x1x16x16xf32>
    %1 = vector.shape_cast %0 : vector<1x1x16x16xf32> to vector<16x16xf32>
    %c0_3 = arith.constant 0 : index
    %c1 = arith.constant 1 : index
    %c0_4 = arith.constant 0 : index
    %c0_5 = arith.constant 0 : index
    %2 = vector.load %arg3[%c0_3, %c1, %c0_4, %c0_5] : memref<1x4x16x16xf32, #tpu.memory_space<vmem>>, vector<1x1x16x16xf32>
    %3 = vector.shape_cast %2 : vector<1x1x16x16xf32> to vector<16x16xf32>
    %c0_6 = arith.constant 0 : index
    %c2 = arith.constant 2 : index
    %c0_7 = arith.constant 0 : index
    %c0_8 = arith.constant 0 : index
    %4 = vector.load %arg3[%c0_6, %c2, %c0_7, %c0_8] : memref<1x4x16x16xf32, #tpu.memory_space<vmem>>, vector<1x1x16x16xf32>
    %5 = vector.shape_cast %4 : vector<1x1x16x16xf32> to vector<16x16xf32>
    %c0_9 = arith.constant 0 : index
    %c3 = arith.constant 3 : index
    %c0_10 = arith.constant 0 : index
    %c0_11 = arith.constant 0 : index
    %6 = vector.load %arg3[%c0_9, %c3, %c0_10, %c0_11] : memref<1x4x16x16xf32, #tpu.memory_space<vmem>>, vector<1x1x16x16xf32>
    %7 = vector.shape_cast %6 : vector<1x1x16x16xf32> to vector<16x16xf32>
    %8 = tpu.concatenate %1, %3, %5, %7 in 1 : vector<16x16xf32>, vector<16x16xf32>, vector<16x16xf32>, vector<16x16xf32> -> vector<16x64xf32>
    %c0_12 = arith.constant 0 : index
    %9 = memref.load %arg1[%c0_12] : memref<4xf32, #tpu.memory_space<smem>>
    %10 = vector.broadcast %9 : f32 to vector<16x16xf32>
    %11 = arith.mulf %10, %1 : vector<16x16xf32>
    %c1_13 = arith.constant 1 : index
    %12 = memref.load %arg1[%c1_13] : memref<4xf32, #tpu.memory_space<smem>>
    %13 = vector.broadcast %12 : f32 to vector<16x16xf32>
    %14 = arith.mulf %13, %3 : vector<16x16xf32>
    %15 = arith.addf %11, %14 : vector<16x16xf32>
    %c2_14 = arith.constant 2 : index
    %16 = memref.load %arg1[%c2_14] : memref<4xf32, #tpu.memory_space<smem>>
    %17 = vector.broadcast %16 : f32 to vector<16x16xf32>
    %18 = arith.mulf %17, %5 : vector<16x16xf32>
    %19 = arith.addf %15, %18 : vector<16x16xf32>
    %c3_15 = arith.constant 3 : index
    %20 = memref.load %arg1[%c3_15] : memref<4xf32, #tpu.memory_space<smem>>
    %21 = vector.broadcast %20 : f32 to vector<16x16xf32>
    %22 = arith.mulf %21, %7 : vector<16x16xf32>
    %23 = arith.addf %19, %22 : vector<16x16xf32>
    %24 = tpu.transpose %23, [1, 0] : vector<16x16xf32> -> vector<16x16xf32>
    %c0_16 = arith.constant 0 : index
    %c0_17 = arith.constant 0 : index
    %25 = vector.load %arg6[%c0_16, %c0_17] : memref<16x4xf32, #tpu.memory_space<vmem>>, vector<16x4xf32>
    %cst = arith.constant dense<0.000000e+00> : vector<16x4xf32>
    %26 = tpu.matmul %24, %25, %cst {dimension_numbers = #tpu.dot_dimension_numbers<[1], [0], [0], [1], [0, 0, 1, 1], [], []>} : vector<16x16xf32>, vector<16x4xf32>, vector<16x4xf32> -> vector<16x4xf32>
    %c0_18 = arith.constant 0 : index
    %c0_19 = arith.constant 0 : index
    %27 = vector.load %arg5[%c0_18, %c0_19] : memref<1x16xf32, #tpu.memory_space<vmem>>, vector<1x16xf32>
    %cst_20 = arith.constant dense<0.000000e+00> : vector<1x16xf32>
    %28 = tpu.matmul %27, %1, %cst_20 {dimension_numbers = #tpu.dot_dimension_numbers<[1], [0], [0], [1], [0, 0, 1, 1], [], []>} : vector<1x16xf32>, vector<16x16xf32>, vector<1x16xf32> -> vector<1x16xf32>
    %c0_21 = arith.constant 0 : index
    %c0_22 = arith.constant 0 : index
    %29 = vector.load %arg5[%c0_21, %c0_22] : memref<1x16xf32, #tpu.memory_space<vmem>>, vector<1x16xf32>
    %cst_23 = arith.constant dense<0.000000e+00> : vector<1x16xf32>
    %30 = tpu.matmul %29, %3, %cst_23 {dimension_numbers = #tpu.dot_dimension_numbers<[1], [0], [0], [1], [0, 0, 1, 1], [], []>} : vector<1x16xf32>, vector<16x16xf32>, vector<1x16xf32> -> vector<1x16xf32>
    %c0_24 = arith.constant 0 : index
    %c0_25 = arith.constant 0 : index
    %31 = vector.load %arg5[%c0_24, %c0_25] : memref<1x16xf32, #tpu.memory_space<vmem>>, vector<1x16xf32>
    %cst_26 = arith.constant dense<0.000000e+00> : vector<1x16xf32>
    %32 = tpu.matmul %31, %5, %cst_26 {dimension_numbers = #tpu.dot_dimension_numbers<[1], [0], [0], [1], [0, 0, 1, 1], [], []>} : vector<1x16xf32>, vector<16x16xf32>, vector<1x16xf32> -> vector<1x16xf32>
    %c0_27 = arith.constant 0 : index
    %c0_28 = arith.constant 0 : index
    %33 = vector.load %arg5[%c0_27, %c0_28] : memref<1x16xf32, #tpu.memory_space<vmem>>, vector<1x16xf32>
    %cst_29 = arith.constant dense<0.000000e+00> : vector<1x16xf32>
    %34 = tpu.matmul %33, %7, %cst_29 {dimension_numbers = #tpu.dot_dimension_numbers<[1], [0], [0], [1], [0, 0, 1, 1], [], []>} : vector<1x16xf32>, vector<16x16xf32>, vector<1x16xf32> -> vector<1x16xf32>
    %35 = tpu.concatenate %28, %30, %32, %34 in 0 : vector<1x16xf32>, vector<1x16xf32>, vector<1x16xf32>, vector<1x16xf32> -> vector<4x16xf32>
    %cst_30 = arith.constant dense<0.000000e+00> : vector<16x16xf32>
    %36 = tpu.matmul %26, %35, %cst_30 {dimension_numbers = #tpu.dot_dimension_numbers<[1], [0], [0], [1], [0, 0, 1, 1], [], []>} : vector<16x4xf32>, vector<4x16xf32>, vector<16x16xf32> -> vector<16x16xf32>
    %c0_31 = arith.constant 0 : index
    %c0_32 = arith.constant 0 : index
    %37 = vector.load %arg7[%c0_31, %c0_32] : memref<16x16xf32, #tpu.memory_space<vmem>>, vector<16x16xf32>
    %38 = arith.addf %36, %37 : vector<16x16xf32>
    %cst_33 = arith.constant 0.000000e+00 : f32
    %39 = vector.broadcast %cst_33 : f32 to vector<16x16xf32>
    %40 = arith.subf %39, %38 : vector<16x16xf32>
    %41 = math.exp %40 : vector<16x16xf32>
    %cst_34 = arith.constant 1.000000e+00 : f32
    %42 = vector.broadcast %cst_34 : f32 to vector<16x16xf32>
    %43 = arith.addf %42, %41 : vector<16x16xf32>
    %cst_35 = arith.constant 1.000000e+00 : f32
    %44 = vector.broadcast %cst_35 : f32 to vector<16x16xf32>
    %45 = arith.divf %44, %43 : vector<16x16xf32>
    %c0_36 = arith.constant 0 : index
    %c0_37 = arith.constant 0 : index
    %46 = vector.load %arg8[%c0_36, %c0_37] : memref<16x16xf32, #tpu.memory_space<vmem>>, vector<16x16xf32>
    %cst_38 = arith.constant dense<0.000000e+00> : vector<16x16xf32>
    %47 = tpu.matmul %46, %45, %cst_38 {dimension_numbers = #tpu.dot_dimension_numbers<[1], [0], [0], [1], [0, 0, 1, 1], [], []>} : vector<16x16xf32>, vector<16x16xf32>, vector<16x16xf32> -> vector<16x16xf32>
    %cst_39 = arith.constant dense<0xFF800000> : vector<16xf32>
    %48 = vector.multi_reduction <maximumf>, %47, %cst_39 [0] : vector<16x16xf32> to vector<16xf32>
    %49 = vector.shape_cast %48 : vector<16xf32> to vector<1x16xf32>
    %50 = vector.broadcast %49 : vector<1x16xf32> to vector<16x16xf32>
    %51 = arith.subf %47, %50 : vector<16x16xf32>
    %cst_40 = arith.constant dense<0xFF800000> : vector<16xf32>
    %52 = vector.multi_reduction <maximumf>, %51, %cst_40 [1] : vector<16x16xf32> to vector<16xf32>
    %53 = vector.shape_cast %52 : vector<16xf32> to vector<16x1xf32>
    %54 = vector.broadcast %53 : vector<16x1xf32> to vector<16x16xf32>
    %55 = arith.subf %51, %54 : vector<16x16xf32>
    %56 = math.exp %55 : vector<16x16xf32>
    %cst_41 = arith.constant dense<0.000000e+00> : vector<16xf32>
    %57 = vector.multi_reduction <add>, %56, %cst_41 [1] : vector<16x16xf32> to vector<16xf32>
    %58 = vector.shape_cast %57 : vector<16xf32> to vector<16x1xf32>
    %59 = vector.broadcast %58 : vector<16x1xf32> to vector<16x16xf32>
    %60 = arith.divf %56, %59 : vector<16x16xf32>
    %61 = tpu.transpose %60, [1, 0] : vector<16x16xf32> -> vector<16x16xf32>
    %c0_42 = arith.constant 0 : index
    %c0_43 = arith.constant 0 : index
    %c0_44 = arith.constant 0 : index
    %62 = vector.load %arg22[%c0_42, %c0_43, %c0_44] : memref<1x16x16xf32, #tpu.memory_space<vmem>>, vector<1x16x16xf32>
    %63 = vector.shape_cast %62 : vector<1x16x16xf32> to vector<16x16xf32>
    %64 = vector.shape_cast %61 : vector<16x16xf32> to vector<1x16x16xf32>
    tpu.vector_store %arg22[%c0_42, %c0_43, %c0_44], %64 {strides = array<i32>} : memref<1x16x16xf32, #tpu.memory_space<vmem>>, vector<1x16x16xf32>,
    %c0_45 = arith.constant 0 : index
    %65 = memref.load %arg2[%c0_45] : memref<4xf32, #tpu.memory_space<smem>>
    %66 = vector.broadcast %65 : f32 to vector<16x16xf32>
    %67 = arith.mulf %66, %1 : vector<16x16xf32>
    %c1_46 = arith.constant 1 : index
    %68 = memref.load %arg2[%c1_46] : memref<4xf32, #tpu.memory_space<smem>>
    %69 = vector.broadcast %68 : f32 to vector<16x16xf32>
    %70 = arith.mulf %69, %3 : vector<16x16xf32>
    %71 = arith.addf %67, %70 : vector<16x16xf32>
    %c2_47 = arith.constant 2 : index
    %72 = memref.load %arg2[%c2_47] : memref<4xf32, #tpu.memory_space<smem>>
    %73 = vector.broadcast %72 : f32 to vector<16x16xf32>
    %74 = arith.mulf %73, %5 : vector<16x16xf32>
    %75 = arith.addf %71, %74 : vector<16x16xf32>
    %c3_48 = arith.constant 3 : index
    %76 = memref.load %arg2[%c3_48] : memref<4xf32, #tpu.memory_space<smem>>
    %77 = vector.broadcast %76 : f32 to vector<16x16xf32>
    %78 = arith.mulf %77, %7 : vector<16x16xf32>
    %79 = arith.addf %75, %78 : vector<16x16xf32>
    %c0_49 = arith.constant 0 : index
    %c0_50 = arith.constant 0 : index
    %80 = vector.load %arg10[%c0_49, %c0_50] : memref<16x4xf32, #tpu.memory_space<vmem>>, vector<16x4xf32>
    %cst_51 = arith.constant dense<0.000000e+00> : vector<16x4xf32>
    %81 = tpu.matmul %79, %80, %cst_51 {dimension_numbers = #tpu.dot_dimension_numbers<[1], [0], [0], [1], [0, 0, 1, 1], [], []>} : vector<16x16xf32>, vector<16x4xf32>, vector<16x4xf32> -> vector<16x4xf32>
    %c0_52 = arith.constant 0 : index
    %c0_53 = arith.constant 0 : index
    %82 = vector.load %arg9[%c0_52, %c0_53] : memref<64x4xf32, #tpu.memory_space<vmem>>, vector<64x4xf32>
    %cst_54 = arith.constant dense<0.000000e+00> : vector<16x4xf32>
    %83 = tpu.matmul %8, %82, %cst_54 {dimension_numbers = #tpu.dot_dimension_numbers<[1], [0], [0], [1], [0, 0, 1, 1], [], []>} : vector<16x64xf32>, vector<64x4xf32>, vector<16x4xf32> -> vector<16x4xf32>
    %84 = tpu.transpose %83, [1, 0] : vector<16x4xf32> -> vector<4x16xf32>
    %cst_55 = arith.constant dense<0.000000e+00> : vector<16x16xf32>
    %85 = tpu.matmul %81, %84, %cst_55 {dimension_numbers = #tpu.dot_dimension_numbers<[1], [0], [0], [1], [0, 0, 1, 1], [], []>} : vector<16x4xf32>, vector<4x16xf32>, vector<16x16xf32> -> vector<16x16xf32>
    %c0_56 = arith.constant 0 : index
    %c0_57 = arith.constant 0 : index
    %86 = vector.load %arg11[%c0_56, %c0_57] : memref<16x16xf32, #tpu.memory_space<vmem>>, vector<16x16xf32>
    %87 = arith.addf %85, %86 : vector<16x16xf32>
    %cst_58 = arith.constant 0.000000e+00 : f32
    %88 = vector.broadcast %cst_58 : f32 to vector<16x16xf32>
    %89 = arith.subf %88, %87 : vector<16x16xf32>
    %90 = math.exp %89 : vector<16x16xf32>
    %cst_59 = arith.constant 1.000000e+00 : f32
    %91 = vector.broadcast %cst_59 : f32 to vector<16x16xf32>
    %92 = arith.addf %91, %90 : vector<16x16xf32>
    %cst_60 = arith.constant 1.000000e+00 : f32
    %93 = vector.broadcast %cst_60 : f32 to vector<16x16xf32>
    %94 = arith.divf %93, %92 : vector<16x16xf32>
    %c0_61 = arith.constant 0 : index
    %c0_62 = arith.constant 0 : index
    %95 = vector.load %arg12[%c0_61, %c0_62] : memref<16x16xf32, #tpu.memory_space<vmem>>, vector<16x16xf32>
    %cst_63 = arith.constant dense<0.000000e+00> : vector<16x16xf32>
    %96 = tpu.matmul %95, %94, %cst_63 {dimension_numbers = #tpu.dot_dimension_numbers<[1], [0], [0], [1], [0, 0, 1, 1], [], []>} : vector<16x16xf32>, vector<16x16xf32>, vector<16x16xf32> -> vector<16x16xf32>
    %cst_64 = arith.constant dense<0xFF800000> : vector<16xf32>
    %97 = vector.multi_reduction <maximumf>, %96, %cst_64 [0] : vector<16x16xf32> to vector<16xf32>
    %98 = vector.shape_cast %97 : vector<16xf32> to vector<1x16xf32>
    %99 = vector.broadcast %98 : vector<1x16xf32> to vector<16x16xf32>
    %100 = arith.subf %96, %99 : vector<16x16xf32>
    %cst_65 = arith.constant dense<0xFF800000> : vector<16xf32>
    %101 = vector.multi_reduction <maximumf>, %100, %cst_65 [1] : vector<16x16xf32> to vector<16xf32>
    %102 = vector.shape_cast %101 : vector<16xf32> to vector<16x1xf32>
    %103 = vector.broadcast %102 : vector<16x1xf32> to vector<16x16xf32>
    %104 = arith.subf %100, %103 : vector<16x16xf32>
    %105 = math.exp %104 : vector<16x16xf32>
    %cst_66 = arith.constant dense<0.000000e+00> : vector<16xf32>
    %106 = vector.multi_reduction <add>, %105, %cst_66 [1] : vector<16x16xf32> to vector<16xf32>
    %107 = vector.shape_cast %106 : vector<16xf32> to vector<16x1xf32>
    %108 = vector.broadcast %107 : vector<16x1xf32> to vector<16x16xf32>
    %109 = arith.divf %105, %108 : vector<16x16xf32>
    %c0_67 = arith.constant 0 : index
    %c0_68 = arith.constant 0 : index
    %c0_69 = arith.constant 0 : index
    %110 = vector.load %arg21[%c0_67, %c0_68, %c0_69] : memref<1x16x16xf32, #tpu.memory_space<vmem>>, vector<1x16x16xf32>
    %111 = vector.shape_cast %110 : vector<1x16x16xf32> to vector<16x16xf32>
    %112 = vector.shape_cast %109 : vector<16x16xf32> to vector<1x16x16xf32>
    tpu.vector_store %arg21[%c0_67, %c0_68, %c0_69], %112 {strides = array<i32>} : memref<1x16x16xf32, #tpu.memory_space<vmem>>, vector<1x16x16xf32>,
    %cst_70 = arith.constant dense<0.000000e+00> : vector<16x16xf32>
    %113 = tpu.matmul %1, %61, %cst_70 {dimension_numbers = #tpu.dot_dimension_numbers<[1], [0], [0], [1], [0, 0, 1, 1], [], []>} : vector<16x16xf32>, vector<16x16xf32>, vector<16x16xf32> -> vector<16x16xf32>
    %cst_71 = arith.constant dense<0.000000e+00> : vector<16x16xf32>
    %114 = tpu.matmul %3, %61, %cst_71 {dimension_numbers = #tpu.dot_dimension_numbers<[1], [0], [0], [1], [0, 0, 1, 1], [], []>} : vector<16x16xf32>, vector<16x16xf32>, vector<16x16xf32> -> vector<16x16xf32>
    %cst_72 = arith.constant dense<0.000000e+00> : vector<16x16xf32>
    %115 = tpu.matmul %5, %61, %cst_72 {dimension_numbers = #tpu.dot_dimension_numbers<[1], [0], [0], [1], [0, 0, 1, 1], [], []>} : vector<16x16xf32>, vector<16x16xf32>, vector<16x16xf32> -> vector<16x16xf32>
    %cst_73 = arith.constant dense<0.000000e+00> : vector<16x16xf32>
    %116 = tpu.matmul %7, %61, %cst_73 {dimension_numbers = #tpu.dot_dimension_numbers<[1], [0], [0], [1], [0, 0, 1, 1], [], []>} : vector<16x16xf32>, vector<16x16xf32>, vector<16x16xf32> -> vector<16x16xf32>
    %117 = tpu.concatenate %113, %114, %115, %116 in 1 : vector<16x16xf32>, vector<16x16xf32>, vector<16x16xf32>, vector<16x16xf32> -> vector<16x64xf32>
    %118 = tpu.iota {dimensions = array<i32: 0>} : vector<16x16xi32>
    %119 = tpu.iota {dimensions = array<i32: 1>} : vector<16x16xi32>
    %120 = arith.cmpi eq, %118, %119 : vector<16x16xi32>
    %121 = arith.extui %120 : vector<16x16xi1> to vector<16x16xi32>
    %122 = arith.sitofp %121 : vector<16x16xi32> to vector<16x16xf32>
    %c0_74 = arith.constant 0 : index
    %c0_75 = arith.constant 0 : index
    %123 = vector.load %arg4[%c0_74, %c0_75] : memref<16x16xf32, #tpu.memory_space<vmem>>, vector<16x16xf32>
    %124 = arith.mulf %109, %122 : vector<16x16xf32>
    %cst_76 = arith.constant dense<0.000000e+00> : vector<16xf32>
    %125 = vector.multi_reduction <add>, %124, %cst_76 [1] : vector<16x16xf32> to vector<16xf32>
    %126 = vector.shape_cast %125 : vector<16xf32> to vector<16x1xf32>
    %127 = vector.broadcast %126 : vector<16x1xf32> to vector<16x64xf32>
    %128 = arith.mulf %127, %117 : vector<16x64xf32>
    %c0_77 = arith.constant 0 : index
    %c0_78 = arith.constant 0 : index
    %c0_79 = arith.constant 0 : index
    %129 = vector.load %arg13[%c0_77, %c0_78, %c0_79] : memref<3x64x128xf32, #tpu.memory_space<vmem>>, vector<1x64x128xf32>
    %130 = vector.shape_cast %129 : vector<1x64x128xf32> to vector<64x128xf32>
    %cst_80 = arith.constant dense<0.000000e+00> : vector<16x128xf32>
    %131 = tpu.matmul %128, %130, %cst_80 {dimension_numbers = #tpu.dot_dimension_numbers<[1], [0], [0], [1], [0, 0, 1, 1], [], []>} : vector<16x64xf32>, vector<64x128xf32>, vector<16x128xf32> -> vector<16x128xf32>
    %132 = arith.mulf %109, %123 : vector<16x16xf32>
    %cst_81 = arith.constant dense<0.000000e+00> : vector<16x64xf32>
    %133 = tpu.matmul %132, %117, %cst_81 {dimension_numbers = #tpu.dot_dimension_numbers<[1], [0], [0], [1], [0, 0, 1, 1], [], []>} : vector<16x16xf32>, vector<16x64xf32>, vector<16x64xf32> -> vector<16x64xf32>
    %c1_82 = arith.constant 1 : index
    %c0_83 = arith.constant 0 : index
    %c0_84 = arith.constant 0 : index
    %134 = vector.load %arg13[%c1_82, %c0_83, %c0_84] : memref<3x64x128xf32, #tpu.memory_space<vmem>>, vector<1x64x128xf32>
    %135 = vector.shape_cast %134 : vector<1x64x128xf32> to vector<64x128xf32>
    %cst_85 = arith.constant dense<0.000000e+00> : vector<16x128xf32>
    %136 = tpu.matmul %133, %135, %cst_85 {dimension_numbers = #tpu.dot_dimension_numbers<[1], [0], [0], [1], [0, 0, 1, 1], [], []>} : vector<16x64xf32>, vector<64x128xf32>, vector<16x128xf32> -> vector<16x128xf32>
    %137 = arith.addf %131, %136 : vector<16x128xf32>
    %cst_86 = arith.constant dense<0.000000e+00> : vector<16x16xf32>
    %138 = tpu.matmul %123, %123, %cst_86 {dimension_numbers = #tpu.dot_dimension_numbers<[1], [0], [0], [1], [0, 0, 1, 1], [], []>} : vector<16x16xf32>, vector<16x16xf32>, vector<16x16xf32> -> vector<16x16xf32>
    %cst_87 = arith.constant 2.000000e+00 : f32
    %139 = vector.broadcast %cst_87 : f32 to vector<16x16xf32>
    %140 = arith.mulf %139, %138 : vector<16x16xf32>
    %141 = arith.subf %140, %122 : vector<16x16xf32>
    %142 = arith.mulf %109, %141 : vector<16x16xf32>
    %cst_88 = arith.constant dense<0.000000e+00> : vector<16x64xf32>
    %143 = tpu.matmul %142, %117, %cst_88 {dimension_numbers = #tpu.dot_dimension_numbers<[1], [0], [0], [1], [0, 0, 1, 1], [], []>} : vector<16x16xf32>, vector<16x64xf32>, vector<16x64xf32> -> vector<16x64xf32>
    %c2_89 = arith.constant 2 : index
    %c0_90 = arith.constant 0 : index
    %c0_91 = arith.constant 0 : index
    %144 = vector.load %arg13[%c2_89, %c0_90, %c0_91] : memref<3x64x128xf32, #tpu.memory_space<vmem>>, vector<1x64x128xf32>
    %145 = vector.shape_cast %144 : vector<1x64x128xf32> to vector<64x128xf32>
    %cst_92 = arith.constant dense<0.000000e+00> : vector<16x128xf32>
    %146 = tpu.matmul %143, %145, %cst_92 {dimension_numbers = #tpu.dot_dimension_numbers<[1], [0], [0], [1], [0, 0, 1, 1], [], []>} : vector<16x64xf32>, vector<64x128xf32>, vector<16x128xf32> -> vector<16x128xf32>
    %147 = arith.addf %137, %146 : vector<16x128xf32>
    %c0_93 = arith.constant 0 : index
    %c0_94 = arith.constant 0 : index
    %148 = vector.load %arg14[%c0_93, %c0_94] : memref<1x128xf32, #tpu.memory_space<vmem>>, vector<1x128xf32>
    %149 = vector.broadcast %148 : vector<1x128xf32> to vector<16x128xf32>
    %150 = arith.addf %147, %149 : vector<16x128xf32>
    %cst_95 = arith.constant 0.000000e+00 : f32
    %151 = vector.broadcast %cst_95 : f32 to vector<16x128xf32>
    %152 = arith.maximumf %150, %151 : vector<16x128xf32>
    %c0_96 = arith.constant 0 : index
    %c0_97 = arith.constant 0 : index
    %153 = vector.load %arg15[%c0_96, %c0_97] : memref<128x128xf32, #tpu.memory_space<vmem>>, vector<128x128xf32>
    %cst_98 = arith.constant dense<0.000000e+00> : vector<16x128xf32>
    %154 = tpu.matmul %152, %153, %cst_98 {dimension_numbers = #tpu.dot_dimension_numbers<[1], [0], [0], [1], [0, 0, 1, 1], [], []>} : vector<16x128xf32>, vector<128x128xf32>, vector<16x128xf32> -> vector<16x128xf32>
    %c0_99 = arith.constant 0 : index
    %c0_100 = arith.constant 0 : index
    %155 = vector.load %arg16[%c0_99, %c0_100] : memref<64x128xf32, #tpu.memory_space<vmem>>, vector<64x128xf32>
    %cst_101 = arith.constant dense<0.000000e+00> : vector<16x128xf32>
    %156 = tpu.matmul %8, %155, %cst_101 {dimension_numbers = #tpu.dot_dimension_numbers<[1], [0], [0], [1], [0, 0, 1, 1], [], []>} : vector<16x64xf32>, vector<64x128xf32>, vector<16x128xf32> -> vector<16x128xf32>
    %157 = arith.addf %154, %156 : vector<16x128xf32>
    %c0_102 = arith.constant 0 : index
    %c0_103 = arith.constant 0 : index
    %158 = vector.load %arg17[%c0_102, %c0_103] : memref<1x128xf32, #tpu.memory_space<vmem>>, vector<1x128xf32>
    %159 = vector.broadcast %158 : vector<1x128xf32> to vector<16x128xf32>
    %160 = arith.addf %157, %159 : vector<16x128xf32>
    %cst_104 = arith.constant 0.000000e+00 : f32
    %161 = vector.broadcast %cst_104 : f32 to vector<16x128xf32>
    %162 = arith.maximumf %160, %161 : vector<16x128xf32>
    %163 = vector.shape_cast %162 : vector<16x128xf32> to vector<1x16x128xf32>
    %cst_105 = arith.constant dense<0.000000e+00> : vector<1xf32>
    %164 = vector.multi_reduction <add>, %163, %cst_105 [1, 2] : vector<1x16x128xf32> to vector<1xf32>
    %165 = vector.shape_cast %164 : vector<1xf32> to vector<1x1x1xf32>
    %166 = vector.extract %165[0, 0, 0] : f32 from vector<1x1x1xf32>
    %cst_106 = arith.constant 2.048000e+03 : f32
    %167 = arith.divf %166, %cst_106 : f32
    %168 = vector.broadcast %167 : f32 to vector<16x128xf32>
    %169 = arith.subf %162, %168 : vector<16x128xf32>
    %170 = arith.mulf %169, %169 : vector<16x128xf32>
    %171 = vector.shape_cast %170 : vector<16x128xf32> to vector<1x16x128xf32>
    %cst_107 = arith.constant dense<0.000000e+00> : vector<1xf32>
    %172 = vector.multi_reduction <add>, %171, %cst_107 [1, 2] : vector<1x16x128xf32> to vector<1xf32>
    %173 = vector.shape_cast %172 : vector<1xf32> to vector<1x1x1xf32>
    %174 = vector.extract %173[0, 0, 0] : f32 from vector<1x1x1xf32>
    %cst_108 = arith.constant 2.048000e+03 : f32
    %175 = arith.divf %174, %cst_108 : f32
    %cst_109 = arith.constant 9.99999974E-6 : f32
    %176 = arith.addf %175, %cst_109 : f32
    %177 = math.rsqrt %176 : f32
    %178 = vector.broadcast %177 : f32 to vector<16x128xf32>
    %179 = arith.mulf %169, %178 : vector<16x128xf32>
    %c0_110 = arith.constant 0 : index
    %c0_111 = arith.constant 0 : index
    %180 = vector.load %arg18[%c0_110, %c0_111] : memref<16x128xf32, #tpu.memory_space<vmem>>, vector<16x128xf32>
    %181 = arith.mulf %179, %180 : vector<16x128xf32>
    %c0_112 = arith.constant 0 : index
    %c0_113 = arith.constant 0 : index
    %182 = vector.load %arg19[%c0_112, %c0_113] : memref<16x128xf32, #tpu.memory_space<vmem>>, vector<16x128xf32>
    %183 = arith.addf %181, %182 : vector<16x128xf32>
    %c0_114 = arith.constant 0 : index
    %c0_115 = arith.constant 0 : index
    %c0_116 = arith.constant 0 : index
    %184 = vector.load %arg20[%c0_114, %c0_115, %c0_116] : memref<1x16x128xf32, #tpu.memory_space<vmem>>, vector<1x16x128xf32>
    %185 = vector.shape_cast %184 : vector<1x16x128xf32> to vector<16x128xf32>
    %186 = vector.shape_cast %183 : vector<16x128xf32> to vector<1x16x128xf32>
    tpu.vector_store %arg20[%c0_114, %c0_115, %c0_116], %186 {strides = array<i32>} : memref<1x16x128xf32, #tpu.memory_space<vmem>>, vector<1x16x128xf32>,
    return
  }
  func.func @transform_0(%arg0: i32) -> i32 {
    %c0_i32 = arith.constant 0 : i32
    %c0_i32_0 = arith.constant 0 : i32
    return %c0_i32 : i32
  }
  func.func @transform_1(%arg0: i32) -> i32 {
    %c0_i32 = arith.constant 0 : i32
    %c0_i32_0 = arith.constant 0 : i32
    return %c0_i32 : i32
  }
  func.func @transform_2(%arg0: i32) -> (i32, i32, i32, i32) {
    %c0_i32 = arith.constant 0 : i32
    %c0_i32_0 = arith.constant 0 : i32
    %c0_i32_1 = arith.constant 0 : i32
    %c0_i32_2 = arith.constant 0 : i32
    return %arg0, %c0_i32, %c0_i32_0, %c0_i32_1 : i32, i32, i32, i32
  }
  func.func @transform_3(%arg0: i32) -> (i32, i32) {
    %c0_i32 = arith.constant 0 : i32
    %c0_i32_0 = arith.constant 0 : i32
    %c0_i32_1 = arith.constant 0 : i32
    return %c0_i32, %c0_i32_0 : i32, i32
  }
  func.func @transform_4(%arg0: i32) -> (i32, i32) {
    %c0_i32 = arith.constant 0 : i32
    %c0_i32_0 = arith.constant 0 : i32
    %c0_i32_1 = arith.constant 0 : i32
    return %c0_i32, %c0_i32_0 : i32, i32
  }
  func.func @transform_5(%arg0: i32) -> (i32, i32) {
    %c0_i32 = arith.constant 0 : i32
    %c0_i32_0 = arith.constant 0 : i32
    %c0_i32_1 = arith.constant 0 : i32
    return %c0_i32, %c0_i32_0 : i32, i32
  }
  func.func @transform_6(%arg0: i32) -> (i32, i32) {
    %c0_i32 = arith.constant 0 : i32
    %c0_i32_0 = arith.constant 0 : i32
    %c0_i32_1 = arith.constant 0 : i32
    return %c0_i32, %c0_i32_0 : i32, i32
  }
  func.func @transform_7(%arg0: i32) -> (i32, i32) {
    %c0_i32 = arith.constant 0 : i32
    %c0_i32_0 = arith.constant 0 : i32
    %c0_i32_1 = arith.constant 0 : i32
    return %c0_i32, %c0_i32_0 : i32, i32
  }
  func.func @transform_8(%arg0: i32) -> (i32, i32) {
    %c0_i32 = arith.constant 0 : i32
    %c0_i32_0 = arith.constant 0 : i32
    %c0_i32_1 = arith.constant 0 : i32
    return %c0_i32, %c0_i32_0 : i32, i32
  }
  func.func @transform_9(%arg0: i32) -> (i32, i32) {
    %c0_i32 = arith.constant 0 : i32
    %c0_i32_0 = arith.constant 0 : i32
    %c0_i32_1 = arith.constant 0 : i32
    return %c0_i32, %c0_i32_0 : i32, i32
  }
  func.func @transform_10(%arg0: i32) -> (i32, i32) {
    %c0_i32 = arith.constant 0 : i32
    %c0_i32_0 = arith.constant 0 : i32
    %c0_i32_1 = arith.constant 0 : i32
    return %c0_i32, %c0_i32_0 : i32, i32
  }
  func.func @transform_11(%arg0: i32) -> (i32, i32) {
    %c0_i32 = arith.constant 0 : i32
    %c0_i32_0 = arith.constant 0 : i32
    %c0_i32_1 = arith.constant 0 : i32
    return %c0_i32, %c0_i32_0 : i32, i32
  }
  func.func @transform_12(%arg0: i32) -> (i32, i32, i32) {
    %c0_i32 = arith.constant 0 : i32
    %c0_i32_0 = arith.constant 0 : i32
    %c0_i32_1 = arith.constant 0 : i32
    %c0_i32_2 = arith.constant 0 : i32
    return %c0_i32, %c0_i32_0, %c0_i32_1 : i32, i32, i32
  }
  func.func @transform_13(%arg0: i32) -> (i32, i32) {
    %c0_i32 = arith.constant 0 : i32
    %c0_i32_0 = arith.constant 0 : i32
    %c0_i32_1 = arith.constant 0 : i32
    return %c0_i32, %c0_i32_0 : i32, i32
  }
  func.func @transform_14(%arg0: i32) -> (i32, i32) {
    %c0_i32 = arith.constant 0 : i32
    %c0_i32_0 = arith.constant 0 : i32
    %c0_i32_1 = arith.constant 0 : i32
    return %c0_i32, %c0_i32_0 : i32, i32
  }
  func.func @transform_15(%arg0: i32) -> (i32, i32) {
    %c0_i32 = arith.constant 0 : i32
    %c0_i32_0 = arith.constant 0 : i32
    %c0_i32_1 = arith.constant 0 : i32
    return %c0_i32, %c0_i32_0 : i32, i32
  }
  func.func @transform_16(%arg0: i32) -> (i32, i32) {
    %c0_i32 = arith.constant 0 : i32
    %c0_i32_0 = arith.constant 0 : i32
    %c0_i32_1 = arith.constant 0 : i32
    return %c0_i32, %c0_i32_0 : i32, i32
  }
  func.func @transform_17(%arg0: i32) -> (i32, i32) {
    %c0_i32 = arith.constant 0 : i32
    %c0_i32_0 = arith.constant 0 : i32
    %c0_i32_1 = arith.constant 0 : i32
    return %c0_i32, %c0_i32_0 : i32, i32
  }
  func.func @transform_18(%arg0: i32) -> (i32, i32) {
    %c0_i32 = arith.constant 0 : i32
    %c0_i32_0 = arith.constant 0 : i32
    %c0_i32_1 = arith.constant 0 : i32
    return %c0_i32, %c0_i32_0 : i32, i32
  }
  func.func @transform_19(%arg0: i32) -> (i32, i32, i32) {
    %c0_i32 = arith.constant 0 : i32
    %c0_i32_0 = arith.constant 0 : i32
    %c0_i32_1 = arith.constant 0 : i32
    return %arg0, %c0_i32, %c0_i32_0 : i32, i32, i32
  }
  func.func @transform_20(%arg0: i32) -> (i32, i32, i32) {
    %c0_i32 = arith.constant 0 : i32
    %c0_i32_0 = arith.constant 0 : i32
    %c0_i32_1 = arith.constant 0 : i32
    return %arg0, %c0_i32, %c0_i32_0 : i32, i32, i32
  }
  func.func @transform_21(%arg0: i32) -> (i32, i32, i32) {
    %c0_i32 = arith.constant 0 : i32
    %c0_i32_0 = arith.constant 0 : i32
    %c0_i32_1 = arith.constant 0 : i32
    return %arg0, %c0_i32, %c0_i32_0 : i32, i32, i32
  }
}

</mosaic_0001>

<bundles_post_ra>
// kernel: st_block_0_forward.1
= control target key start
LH: loop header
LB: loop body
LE: loop exit
PB: predicated region body
PF: predicated region fallthrough
CT: control target
= control target key end

     0   :  { %s4824_s0 = inlined_call_operand.vmem [shape: f32[4], index: 0, kind: input, shape index: {}]   ;;  %s4825_s1 = inlined_call_operand.vmem [shape: f32[4], index: 1, kind: input, shape index: {}]   ;;  %s4826_s2 = inlined_call_operand.vmem [shape: f32[2,4,16,16], index: 2, kind: input, shape index: {}]   ;;  %s4827_s3 = inlined_call_operand.vmem [shape: f32[16,16], index: 3, kind: input, shape index: {}]   ;;  %s4828_s4 = inlined_call_operand.vmem [shape: f32[1,16], index: 4, kind: input, shape index: {}]   ;;  %s4829_s5 = inlined_call_operand.vmem [shape: f32[16,4], index: 5, kind: input, shape index: {}]   ;;  %s4830_s6 = inlined_call_operand.vmem [shape: f32[16,16], index: 6, kind: input, shape index: {}]   ;;  %s4831_s7 = inlined_call_operand.vmem [shape: f32[16,16], index: 7, kind: input, shape index: {}]   ;;  %s4832_s8 = inlined_call_operand.vmem [shape: f32[64,4], index: 8, kind: input, shape index: {}]   ;;  %s4833_s9 = inlined_call_operand.vmem [shape: f32[16,4], index: 9, kind: input, shape index: {}]   ;;  %s4834_s10 = inlined_call_operand.vmem [shape: f32[16,16], index: 10, kind: input, shape index: {}]   ;;  %s4835_s11 = inlined_call_operand.vmem [shape: f32[16,16], index: 11, kind: input, shape index: {}]   ;;  %s4836_s12 = inlined_call_operand.vmem [shape: f32[3,64,128], index: 12, kind: input, shape index: {}]   ;;  %s4837_s13 = inlined_call_operand.vmem [shape: f32[1,128], index: 13, kind: input, shape index: {}]   ;;  %s4838_s14 = inlined_call_operand.vmem [shape: f32[128,128], index: 14, kind: input, shape index: {}]   ;;  %s4839_s15 = inlined_call_operand.vmem [shape: f32[64,128], index: 15, kind: input, shape index: {}]   ;;  %s4840_s16 = inlined_call_operand.vmem [shape: f32[1,128], index: 16, kind: input, shape index: {}]   ;;  %s4841_s17 = inlined_call_operand.vmem [shape: f32[16,128], index: 17, kind: input, shape index: {}]   ;;  %s4842_s18 = inlined_call_operand.vmem [shape: f32[16,128], index: 18, kind: input, shape index: {}]   ;;  %s4843_s19 = inlined_call_operand.vmem [shape: f32[2,16,128], index: 19, kind: output, shape index: {0}]   ;;  %s4844_s20 = inlined_call_operand.hbm [shape: f32[2,16,16], index: 20, kind: output, shape index: {1}]   ;;  %s4845_s21 = inlined_call_operand.hbm [shape: f32[2,16,16], index: 21, kind: output, shape index: {2}]  }
   0x1   :  { %4864 = sst [smem:[#allocation19_spill]] %s4824_s0 }
   0x2   :  { %4865 = sst [smem:[#allocation20_spill]] %s4825_s1 }
   0x3   :  { %4866 = sst [smem:[#allocation21_spill]] %s4826_s2 }
   0x4   :  { %4867 = sst [smem:[#allocation22_spill]] %s4827_s3 }
   0x5   :  { %4868 = sst [smem:[#allocation23_spill]] %s4828_s4 }
   0x6   :  { %4869 = sst [smem:[#allocation24_spill]] %s4829_s5 }
   0x7   :  { %4870 = sst [smem:[#allocation25_spill]] %s4830_s6 }
   0x8   :  { %4871 = sst [smem:[#allocation26_spill]] %s4831_s7 }
   0x9   :  { %4872 = sst [smem:[#allocation27_spill]] %s4832_s8 }
   0xa   :  { %4873 = sst [smem:[#allocation28_spill]] %s4833_s9 }
   0xb   :  { %27 = vsyncpa [#allocation4], 0 }
   0xc   :  { %28 = vsyncpa [#allocation6], 0 }
   0xd   :  { %29 = vsyncpa [#allocation3], 0 }
   0xe   :  { %31 = vsyncpa [#allocation3 + $0x1], 0 }
   0xf   :  { %32 = vsyncpa [#allocation9], 0 }
  0x10   :  { %34 = vsyncpa [#allocation9 + $0x1], 0  ;;  %s4198_s2 = smov 0   ;;  %s4200_s25 = smov 0  }
  0x11   :  { %s4202_s26 = smov 0   ;;  %s4204_s27 = smov 0  }
  0x12 LB: > { %4874 = sst [smem:[#allocation14_spill]] %s4062_s2  ;;  %s4219_s3 = sadd.s32 4294967295, %s4074_s27   ;;  %s4074_s27 = sphi %s4204_s27, %s4905_s27   ;;  %s4070_s26 = sphi %s4202_s26, %s4907_s26   ;;  %s4066_s25 = sphi %s4200_s25, %s4909_s25   ;;  %s4062_s2 = sphi %s4198_s2, %s4908_s2  }
  0x13   : > { %4875 = sst [smem:[#allocation15_spill]] %s4070_s26  ;;  %s3170_s28 = sadd.s32 4294967294, %s4074_s27  }
  0x14   : > { %s4223_s29 = sadd.s32 1, %s4074_s27   ;;  %s477_s0 = sadd.s32 1, %s4070_s26 }
  0x15   : > { %4876 = sst [smem:[#allocation16_spill]] %s4223_s29  ;;  %s474_s4 = ssub.s32 %s4074_s27, %s4223_s29 }
  0x16   : > { %p487_p0 = scmp.ne.s32.totalorder %s4070_s26, %s4066_s25  ;;  %p475_p1 = scmp.eq.s32.totalorder %s474_s4, 0 }
  0x17   : > { %p488_p2 = scmp.eq.s32.totalorder %s4219_s3, 1  ;;  %p493_p3 = scmp.ne.s32.totalorder %s4066_s25, %s4062_s2 }
  0x18   : > { %p494_p4 = scmp.eq.s32.totalorder %s3170_s28, 1  ;;  %p3171_p7 = scmp.ge.s32.totalorder %s4074_s27, 1 }
  0x19   : > { %s4234_s30 = scalar_select %p475_p1, %s4070_s26, %s477_s0  }
  0x1a   : > { %p4236_p5 = por %p488_p2, %p487_p0  ;;  %p4240_p6 = por %p494_p4, %p493_p3 }
  0x1b   : > { %4877 = sst [smem:[#allocation17_spill]] %s4234_s30  ;;  %p527_p8 = scmp.lt.s32.totalorder %s4074_s27, 3 }
  0x1c   : > { %s4878_s5 = scalar_select %p4236_p5, 1, 0 }
  0x1d   : > { %s4879_s22 = scalar_select %p4240_p6, 1, 0 }
  0x1e   : > { %p4853_p9 = scmp.eq.s32.totalorder %s4219_s3, 0  ;;  %p4247_p10 = pnand %p3171_p7, %p527_p8 }
  0x1f   : > { %4880 = sst [smem:[#allocation18_spill]] %s4879_s22  ;;  %s4882_s28 = sld [smem:[#allocation19_spill]] }
  0x20   : > { %s4881_s23 = scalar_select %p4247_p10, 1, 0 }
  0x21   : > { %p3847_p11 = pneg %p4247_p10  ;;  %s4883_s26 = sld [smem:[#allocation20_spill]] }
  0x23   : > { %p4261_p12 = pnand %p4853_p9, %p3847_p11 }
  0x25   : > { %s540_s0 = sshll.u32 %s4882_s28, 4  ;;  %p3944_p0 = pneg %p4261_p12  ;;  %s541_s0 = int_to_ptr.vmem [resolvable:$true] %s540_s0 }
  0x26   : > { %s3942_s2 = scalar_lea.vmem %s541_s0, 16  ;;  %p3950_p3 = scmp.lt.s32.totalorder %s541_s0, %s541_s0 }
  0x27   : > { %s551_s29 = sshll.u32 %s4883_s26, 4  ;;  %p3943_p13 = scmp.ne.s32.totalorder %s541_s0, %s3942_s2  ;;  %s552_s29 = int_to_ptr.vmem [resolvable:$true] %s551_s29 }
  0x28   : > { %p3951_p4 = scmp.lt.s32.totalorder %s3942_s2, %s3942_s2 }
  0x29   : > { %p3945_p1 = pnand %p3944_p0, %p3943_p13 }
  0x2a   : > { %p3952_p7 = por %p3951_p4, %p3950_p3 }
  0x2b   : > { %p3946_p2 = pneg %p3945_p1 }
  0x2d   : > { %p3953_p8 = pnand %p3952_p7, %p3946_p2 }
  0x2f   : > { %3956 = shalt.err (!%p3953_p8)
}
  0x30   : > { %s4076_s26 = smov [#allocation2]   ;;  %s3957_s30 = scalar_lea.vmem %s552_s29, 16 }
  0x31   : > { %3850 = dma.vmem_to_smem (!%p4261_p12), %s541_s0, 16, %s4076_s26, [#allocation4]  }
  0x32   : > { %p3958_p11 = scmp.ne.s32.totalorder %s552_s29, %s3957_s30  ;;  %p3965_p5 = scmp.lt.s32.totalorder %s552_s29, %s552_s29 }
  0x33   : > { %p3966_p10 = scmp.lt.s32.totalorder %s3957_s30, %s3957_s30 }
  0x34   : > { %p3960_p9 = pnand %p3958_p11, %p3944_p0 }
  0x35   : > { %p3967_p13 = por %p3966_p10, %p3965_p5 }
  0x36   : > { %p3961_p6 = pneg %p3960_p9 }
  0x38   : > { %p3968_p1 = pnand %p3967_p13, %p3961_p6 }
  0x3a   : > { %3971 = shalt.err (!%p3968_p1)
}
  0x3b   : > { %s4077_s1 = smov [#allocation5]   ;;  %p4885_p2 = scmp.ne.s32.totalorder %s4881_s23, 0 }
  0x3c   : > { %3853 = dma.vmem_to_smem (!%p4261_p12), %s552_s29, 16, %s4077_s1, [#allocation6]  }
  0x3d   : > { %620 = sbr.rel (%p4885_p2) target bundleno = 3203 (0xc83), region = 96  ;;  %p4886_p3 = scmp.eq.s32.totalorder (!%p4885_p2), %s4219_s3, 0 }
  0x44   : > { %4045 = dma.done.wait (%p4886_p3), [#allocation4], 16   ;;  %p4887_p4 = pmov %p4886_p3 }
  0x45   : > { %p4888_p9 = pmov %p4886_p3 }
  0x46   : > { %4047 = vsyncadd (%p4887_p4), [#allocation4], 4294967280 }
  0x47   : > { %4049 = dma.done.wait (%p4888_p9), [#allocation6], 16   ;;  %p4889_p5 = pmov %p4886_p3 }
  0x49   : > { %4051 = vsyncadd (%p4889_p5), [#allocation6], 4294967280 }
  0x4a   : > { %630 = sfence }
  0x4b   : > { %p695_p6 = scmp.lt.s32.totalorder %s4219_s3, 1  ;;  %s749_s2 = sld [smem:[#allocation2]]  ;;  %v4078_v29 = vmov 0.0|0.0   ;;  %vm4079_vm0 = vmmov 0   ;;  %v4080_v30 = vmov 0.0   ;;  %vm740_vm1 = vcmask 130048  }
  0x4c   : > { %s3190_s29 = sld [smem:[#allocation2 + $0x1]]  ;;  %s3191_s22 = sld [smem:[#allocation2 + $0x2]]  ;;  %3659 = vmatprep.subr.bf16.mxu1 %v4078_v29  ;;  %3427 = vmatprep.mubr.msk.f32.mxu1 %vm4079_vm0, %v4080_v30  ;;  %vm1187_vm2 = vcmask 31744   ;;  %vm1179_vm3 = vcmask 1040384   ;;  %vm1181_vm4 = vcmask 1041408   ;;  %vm1183_vm5 = vcmask 1042432  }
  0x4d   : > { %s4283_s23 = scalar_select %p695_p6, %s4219_s3, 1  ;;  %vm1194_vm6 = vcmask 1043456   ;;  %vm743_vm7 = vcmask 261120   ;;  %vm746_vm8 = vcmask 392192   ;;  %vm1548_vm9 = vcmask 523264   ;;  %vm3690_vm10 = vmpackc.low %vm1187_vm2, %vm1187_vm2 }
  0x4e   : > { %s3192_s24 = sld [smem:[#allocation2 + $0x3]]  ;;  %s4890_s26 = sld [smem:[#allocation21_spill]] }
  0x4f   : > { %s3267_s28 = sshll.u32 %s4283_s23, 6  ;;  %s4892_s4 = sld [smem:[#allocation23_spill]] }
  0x50   : > { %s4856_s1 = smov 48   ;;  %s4893_s7 = sld [smem:[#allocation26_spill]] }
  0x51   : > { %v750_v3 = vstv %s749_s2  ;;  %s3205_s0 = sld [smem:[#allocation5 + $0x2]]  ;;  %s4894_s9 = sld [smem:[#allocation28_spill]] }
  0x52   : > { %v754_v6 = vstv %s3190_s29  ;;  %v760_v7 = vstv %s3191_s22  ;;  %s4891_s29 = sld [smem:[#allocation24_spill]]  ;;  %s4895_s6 = sld [smem:[#allocation25_spill]] }
  0x53   : > { %s4896_s8 = sld [smem:[#allocation27_spill]]  ;;  %s4898_s2 = smov 32  }
  0x54   : > { %s699_s30 = scalar_lea.vmem %s4890_s26, %s3267_s28  ;;  %v766_v14 = vstv %s3192_s24  ;;  %s4860_s26 = smov 16  }
  0x55   : > { %v4289_v0 = vld [vmem:[%s699_s30] sm:$0xff]  ;;  %v4291_v1 = vld [vmem:[%s699_s30 + $0x10] sm:$0xff]  ;;  %v4298_v8 = vld [vmem:[%s699_s30 + $0x8] sm:$0xff]  ;;  %s1435_s24 = sld [smem:[#allocation5]]  ;;  %s3204_s28 = sld [smem:[#allocation5 + $0x1]] }
  0x56   : > { %v4293_v2 = vld [vmem:[%s699_s30 + $0x20] sm:$0xff]  ;;  %v4295_v4 = vld [vmem:[%s699_s30 + $0x30] sm:$0xff]  ;;  %v751_v5 = vmul.f32 %v750_v3, %v4289_v0  ;;  %v755_v9 = vmul.f32 %v4291_v1, %v754_v6  ;;  %v4302_v11 = vld [vmem:[%s699_s30 + $0x18] sm:$0xff]  ;;  %v752_v13 = vmul.f32 %v750_v3, %v4298_v8  ;;  %v3654_v34 = vpack.c.bf16 %v4298_v8, %v4289_v0  ;;  %718 = vrot.lane.b32.xlu1 %v4291_v1, %s4860_s26  ;;  %s4899_s22 = smov 48   ;;  %p4901_p12 = scmp.ne.s32.totalorder %s4878_s5, 0 }
  0x57   : > { %v761_v10 = vmul.f32 %v4293_v2, %v760_v7  ;;  %v4304_v12 = vld [vmem:[%s699_s30 + $0x28] sm:$0xff]  ;;  %v4307_v15 = vld [vmem:[%s699_s30 + $0x38] sm:$0xff]  ;;  %v756_v16 = vmul.f32 %v4302_v11, %v754_v6  ;;  %v767_v19 = vmul.f32 %v4295_v4, %v766_v14  ;;  %v886_v32 = vld [vmem:[%s4892_s4] sm:$0x1]  ;;  %v3657_v36 = vpack.c.bf16 %v4302_v11, %v4291_v1  ;;  %s4858_s30 = smov 32   ;;  %s3206_s4 = sld [smem:[#allocation5 + $0x3]] }
  0x58   : > { %v762_v17 = vmul.f32 %v4304_v12, %v760_v7  ;;  %v757_v18 = vadd.f32 %v755_v9, %v751_v5  ;;  %v768_v22 = vmul.f32 %v4307_v15, %v766_v14  ;;  %v803_v25 = vld [vmem:[%s4891_s29] sm:$0xff]  ;;  %v804_v26 = vld [vmem:[%s4891_s29 + $0x8] sm:$0xff]  ;;  %v3660_v31 = vpack.c.bf16 %v4304_v12, %v4293_v2  ;;  %s4457_s29 = sand.u32 1, %s4066_s25  }
  0x59   : > { %v758_v20 = vadd.f32 %v756_v16, %v752_v13  ;;  %v3649_v27 = vpack.c.bf16 %v804_v26, %v803_v25  ;;  %v3663_v37 = vpack.c.bf16 %v4307_v15, %v4295_v4  ;;  %v1285_v54 = vld [vmem:[%s4893_s7] sm:$0xff]  ;;  %v1458_v58 = vld [vmem:[%s4894_s9 + $0x8] sm:$0xff]  ;;  %v1446_v3 = vstv %s3205_s0  ;;  %s4900_s0 = sld [smem:[#allocation22_spill]] }
  0x5a   : > { %v763_v21 = vadd.f32 %v761_v10, %v757_v18  ;;  %3661 = vmatpush3.bf16.msra.mxu1 %v3660_v31  ;;  %720 = vrot.lane.b32.xlu1 %v4302_v11, %s4860_s26  ;;  %v1457_v57 = vld [vmem:[%s4894_s9] sm:$0xff]  ;;  %v1447_v6 = vmul.f32 %v4293_v2, %v1446_v3  ;;  %v1448_v7 = vmul.f32 %v4304_v12, %v1446_v3  ;;  %s3178_s26 = sshll.u32 %s4457_s29, 4 }
  0x5b   : > { %v764_v23 = vadd.f32 %v762_v17, %v758_v20  ;;  %3650 = vmatprep.subr.bf16.mxu0 %v3649_v27  ;;  %v1436_v55 = vstv %s1435_s24  ;;  %v1440_v56 = vstv %s3204_s28  ;;  %v3669_v63 = vpack.c.bf16 %v1458_v58, %v1457_v57  ;;  %v1186_v20 = vld [vmem:[%s4895_s6 + $0x8] sm:$0xff]  ;;  %v1547_v57 = vld [vmem:[%s4896_s8 + $0x38] sm:$0xff] }
  0x5c   : > { %v769_v24 = vadd.f32 %v767_v19, %v763_v21  ;;  %3652 = vmatpush3.bf16.msra.mxu0 %v3649_v27  ;;  %v1437_v59 = vmul.f32 %v1436_v55, %v4289_v0  ;;  %v1438_v60 = vmul.f32 %v1436_v55, %v4298_v8  ;;  %v1441_v61 = vmul.f32 %v4291_v1, %v1440_v56  ;;  %v1185_v21 = vld [vmem:[%s4895_s6] sm:$0xff] }
  0x5d   : > { %v770_v28 = vadd.f32 %v768_v22, %v764_v23  ;;  %3653 = vmatprep.subr.bf16.mxu0 %v4078_v29  ;;  %3428 = vmatmul.mubr.msk.f32.vlgmr.msra.gmra.mrb[0].mxu1 %vm740_vm1, %v886_v32  ;;  %v1442_v62 = vmul.f32 %v4302_v11, %v1440_v56  ;;  %v1452_v10 = vstv %s3206_s4  ;;  %v1546_v56 = vld [vmem:[%s4896_s8 + $0x30] sm:$0xff]  ;;  %s3269_s4 = sshll.u32 %s4219_s3, 8 }
  0x5e   : > { %771 = vxpose.xlu0.b32.start [1/2] (short) (narrow) %v769_v24, 16  ;;  %728 = vrot.lane.b32.xlu1 %v4304_v12, %s4858_s30  ;;  %v1443_v5 = vadd.f32 %v1441_v61, %v1437_v59  ;;  %v1453_v14 = vmul.f32 %v4295_v4, %v1452_v10  ;;  %v1454_v16 = vmul.f32 %v4307_v15, %v1452_v10 }
  0x5f   : > { %v1444_v9 = vadd.f32 %v1442_v62, %v1438_v60  ;;  %v3685_v58 = vpack.c.bf16 %v1547_v57, %v1546_v56  ;;  %v1732_v56 = vld [vmem:[%s4835_s11 + $0x8] sm:$0xff] }
  0x60   : > { %v1449_v13 = vadd.f32 %v1447_v6, %v1443_v5 }
  0x61   : > { %v1450_v17 = vadd.f32 %v1448_v7, %v1444_v9 }
  0x62   : > { %772 = vxpose.xlu0.b32.end [2/2] (short) (narrow) %v770_v28, 16  ;;  %734 = vrot.lane.b32.xlu1 %v4295_v4, %s4856_s1  ;;  %v1455_v18 = vadd.f32 %v1453_v14, %v1449_v13 }
  0x63   : > { %v1456_v19 = vadd.f32 %v1454_v16, %v1450_v17 }
  0x66   : > { %736 = vrot.lane.b32.xlu1 %v4307_v15, %s4856_s1  ;;  %s4897_s1 = smov 16  }
  0x8b   : > { %726 = vrot.lane.b32.xlu0 %v4293_v2, %s4858_s30  ;;  %s4462_s30 = scalar_lea.vmem [#allocation8], %s3178_s26 }
  0x8c   : > { %s3029_s28 = sshll.u32 %s4462_s30, 4  ;;  %s4722_s28 = int_to_ptr.vmem [resolvable:$true] %s3029_s28 }
  0xde   : > { %v787_v33 = vpop.trf.xlu0 }
  0xdf   : > { %3406 = vmatprep.mubr.msk.f32.mxu0 %vm740_vm1, %v787_v33 }
  0xe2   : > { %v788_v35 = vpop.trf.xlu0 }
  0xe3   : > { %3407 = vmatmul.mubr.msk.f32.vlgmr.msra.gmra.mrb[0].mxu0 %vm740_vm1, %v788_v35 }
  0xe4   : > { %3655 = vmatpush3.bf16.msra.mxu0 %v3654_v34  ;;  %3413 = vmatprep.mubr.msk.f32.mxu0 %vm4079_vm0, %v4080_v30 }
  0xe5   : > { %3656 = vmatprep.subr.bf16.mxu0 %v4078_v29 }
  0xe7   : > { %3414 = vmatmul.mubr.msk.f32.vlgmr.msra.gmra.mrb[2].mxu0 %vm740_vm1, %v886_v32 }
  0xe8   : > { %3658 = vmatpush3.bf16.msra.mxu0 %v3657_v36  ;;  %3420 = vmatprep.mubr.msk.f32.mxu0 %vm4079_vm0, %v4080_v30 }
  0xe9   : > { %3662 = vmatprep.subr.bf16.mxu0 %v4078_v29 }
  0xeb   : > { %3421 = vmatmul.mubr.msk.f32.vlgmr.msra.gmra.mrb[4].mxu0 %vm740_vm1, %v886_v32 }
  0xec   : > { %3664 = vmatpush3.bf16.msra.mxu0 %v3663_v37  ;;  %3434 = vmatprep.mubr.msk.f32.mxu0 %vm4079_vm0, %v4080_v30  ;;  %v1540_v37 = vld [vmem:[%s4896_s8] sm:$0xff] }
  0xef   : > { %3435 = vmatmul.mubr.msk.f32.vlgmr.msra.gmra.mrb[6].mxu0 %vm740_vm1, %v886_v32  ;;  %v719_v32 = vpop.permute.xlu1 %718 }
  0xf0   : > { %3446 = vmatprep.mubr.msk.f32.mxu0 %vm740_vm1, %v1285_v54  ;;  %v1545_v54 = vld [vmem:[%s4896_s8 + $0x28] sm:$0xff] }
  0xf3   : > { %v721_v36 = vpop.permute.xlu1 %720 }
  0xf4   : > { %v742_v59 = vsel %vm740_vm1, %v4298_v8, %v721_v36 }
 0x130   : > { %v1096_v38 = vpop.f32.mrb[0].mxu1 }
 0x131   : > { %v3429_v39 = vpop.f32.mrb[1].mxu1  ;;  %v1174_v45 = vrot.slane %v1096_v38, 6  ;;  %v1541_v38 = vld [vmem:[%s4896_s8 + $0x8] sm:$0xff] }
 0x132   : > { %v729_v39 = vpop.permute.xlu1 %728 }
 0x133   : > { %v745_v60 = vsel %vm743_vm7, %v742_v59, %v729_v39  ;;  %v1630_v39 = vld [vmem:[%s4834_s10] sm:$0xff] }
 0x1b6   : > { %v3408_v40 = vpop.f32.mrb[0].mxu0 }
 0x1b7   : > { %v877_v41 = vpop.f32.mrb[1].mxu0 }
 0x1b8   : > { %3439 = vmatprep.mubr.msk.f32.mxu1 %vm1187_vm2, %v877_v41  ;;  %v741_v41 = vsel %vm740_vm1, %v4289_v0, %v719_v32 }
 0x1ba   : > { %v956_v42 = vpop.f32.mrb[2].mxu0 }
 0x1bb   : > { %v3415_v43 = vpop.f32.mrb[3].mxu0 }
 0x1be   : > { %v1026_v44 = vpop.f32.mrb[4].mxu0 }
 0x1bf   : > { %v1171_v46 = vrot.slane %v1026_v44, 7  ;;  %v3422_v47 = vpop.f32.mrb[5].mxu0 }
 0x1c0   : > { %v1543_v47 = vld [vmem:[%s4896_s8 + $0x18] sm:$0xff] }
 0x1c1   : > { %v1180_v48 = vsel %vm1179_vm3, %v956_v42, %v1171_v46  ;;  %v727_v42 = vpop.permute.xlu0 %726  ;;  %v1542_v46 = vld [vmem:[%s4896_s8 + $0x10] sm:$0xff] }
 0x1c2   : > { %v1182_v49 = vsel %vm1181_vm4, %v1180_v48, %v1174_v45  ;;  %v1166_v50 = vpop.f32.mrb[6].mxu0  ;;  %v3673_v45 = vpack.c.bf16 %v1541_v38, %v1540_v37  ;;  %v744_v48 = vsel %vm743_vm7, %v741_v41, %v727_v42  ;;  %v1631_v38 = vld [vmem:[%s4834_s10 + $0x8] sm:$0xff] }
 0x1c3   : > { %v1177_v51 = vrot.slane %v1166_v50, 5  ;;  %v3436_v52 = vpop.f32.mrb[7].mxu0  ;;  %v735_v50 = vpop.permute.xlu1 %734 }
 0x1c4   : > { %v4403_v52 = vsel %vm746_vm8, %v744_v48, %v735_v50 }
 0x1c5   : > { %v1184_v53 = vsel %vm1183_vm5, %v1182_v49, %v1177_v51  ;;  %v1286_v49 = vld [vmem:[%s4893_s7 + $0x8] sm:$0xff]  ;;  %v3677_v51 = vpack.c.bf16 %v1543_v47, %v1542_v46 }
 0x1c6   : > { %3437 = vmatprep.subr.msk.mxu1 %vm1194_vm6, %v1184_v53 }
 0x1c7   : > { %3438 = vmatpush3.msk.msra.mxu1 %vm1194_vm6, %v1184_v53  ;;  %v1544_v53 = vld [vmem:[%s4896_s8 + $0x20] sm:$0xff]  ;;  %v737_v61 = vpop.permute.xlu1 %736  ;;  %s4728_s8 = scalar_lea.hbm %s4844_s20, %s3269_s4 }
 0x1c8   : > { %3440 = vmatmul.mubr.msk.f32.vlgmr.msra.gmra.mrb[2].mxu1 %vm1187_vm2, %v3408_v40  ;;  %3670 = vmatprep.subr.bf16.mxu1 %v3669_v63  ;;  %v3681_v55 = vpack.c.bf16 %v1545_v54, %v1544_v53  ;;  %v4424_v62 = vsel %vm746_vm8, %v745_v60, %v737_v61 }
 0x1c9   : > { %3672 = vmatpush3.bf16.msra.mxu1 %v3669_v63  ;;  %3453 = vmatprep.mubr.msk.f32.mxu1 %vm740_vm1, %v1455_v18 }
 0x1cc   : > { %3454 = vmatmul.mubr.msk.f32.vlgmr.msra.gmra.mrb[4].mxu1 %vm740_vm1, %v1456_v19 }
 0x29b   : > { %v3441_v22 = vpop.f32.mrb[2].mxu1 }
 0x29c   : > { %v1270_v23 = vadd.f32 %v3441_v22, %v1186_v20  ;;  %v1264_v24 = vpop.f32.mrb[3].mxu1 }
 0x29d   : > { %v1265_v25 = vadd.f32 %v1264_v24, %v1185_v21 }
 0x29e   : > { %v1274_v26 = vsub.f32 0.0, %v1270_v23 }
 0x29f   : > { %v1273_v27 = vsub.f32 0.0, %v1265_v25  ;;  %v3455_v63 = vpop.f32.mrb[4].mxu1 }
 0x2a0   : > { %v1277_v28 = vmul.f32 1.442695, %v1274_v26  ;;  %v1531_v3 = vpop.f32.mrb[5].mxu1  ;;  %v1731_v26 = vld [vmem:[%s4835_s11] sm:$0xff] }
 0x2a1   : > { %v1275_v29 = vmul.f32 1.442695, %v1273_v27  ;;  %3479 = vmatprep.mubr.msk.f32.mxu1 %vm1187_vm2, %v1531_v3 }
 0x2a2   : > { %3908 = vpow2.f32 %v1277_v28 }
 0x2a3   : > { %3910 = vpow2.f32 %v1275_v29 }
 0x2ac   : > { %v3909_v31 = vpop.eup %3908 }
 0x2ad   : > { %v3911_v33 = vpop.eup %3910  ;;  %v1280_v34 = vadd.f32 1.0, %v3909_v31 }
 0x2ae   : > { %v1279_v35 = vadd.f32 1.0, %v3911_v33 }
 0x2af   : > { %3912 = vrcp.f32 %v1280_v34 }
 0x2b0   : > { %3914 = vrcp.f32 %v1279_v35 }
 0x2b9   : > { %v3913_v40 = vpop.eup %3912 }
 0x2ba   : > { %v3915_v43 = vpop.eup %3914 }
 0x2bb   : > { %v3665_v44 = vpack.c.bf16 %v3913_v40, %v3915_v43 }
 0x2bd   : > { %3666 = vmatprep.subr.bf16.mxu0 %v3665_v44 }
 0x2be   : > { %3668 = vmatpush3.bf16.msra.mxu0 %v3665_v44 }
 0x2bf   : > { %3674 = vmatprep.subr.bf16.mxu0 %v3673_v45 }
 0x2c1   : > { %3447 = vmatmul.mubr.msk.f32.vlgmr.msra.gmra.mrb[8].mxu0 %vm740_vm1, %v1286_v49 }
 0x2c2   : > { %3676 = vmatpush3.bf16.msra.mxu0 %v3673_v45  ;;  %3472 = vmatprep.mubr.msk.f32.mxu0 %vm1548_vm9, %v4403_v52 }
 0x2c3   : > { %3678 = vmatprep.subr.bf16.mxu0 %v3677_v51 }
 0x2c6   : > { %3680 = vmatpush3.bf16.msra.mxu0 %v3677_v51 }
 0x2c7   : > { %3682 = vmatprep.subr.bf16.mxu0 %v3681_v55 }
 0x2ca   : > { %3684 = vmatpush3.bf16.msra.mxu0 %v3681_v55 }
 0x2cb   : > { %3686 = vmatprep.subr.bf16.mxu0 %v3685_v58 }
 0x2ce   : > { %3688 = vmatpush3.bf16.msra.mxu0 %v3685_v58 }
 0x2d1   : > { %3473 = vmatmul.mubr.msk.f32.vlgmr.msra.gmra.mrb[10].mxu0 %vm1548_vm9, %v4424_v62 }
 0x2d2   : > { %3500 = vmatprep.mubr.msk.f32.mxu0 %vm740_vm1, %v4291_v1 }
 0x394   : > { %v3448_v5 = vpop.f32.mrb[8].mxu0 }
 0x395   : > { %v1369_v6 = vsel %vm740_vm1, %v3448_v5, -inf  ;;  %v1359_v7 = vpop.f32.mrb[9].mxu0 }
 0x396   : > { %v1368_v9 = vsel %vm740_vm1, %v1359_v7, -inf }
 0x397   : > { %v1370_v10 = vmax.f32 %v1368_v9, %v1369_v6 }
 0x399   : > { %v1371_v13 = vrot.slane %v1370_v10, 4 }
 0x39b   : > { %v1372_v14 = vmax.f32 %v1370_v10, %v1371_v13 }
 0x39d   : > { %v1373_v16 = vrot.slane %v1372_v14, 2 }
 0x39f   : > { %v1374_v17 = vmax.f32 %v1372_v14, %v1373_v16 }
 0x3a1   : > { %v1375_v18 = vrot.slane %v1374_v17, 1 }
 0x3a3   : > { %v1376_v19 = vmax.f32 %v1374_v17, %v1375_v18 }
 0x3a4   : > { %v3474_v20 = vpop.f32.mrb[10].mxu0 }
 0x3a5   : > { %v1377_v21 = vsub.f32 %v1359_v7, %v1376_v19  ;;  %v1621_v1 = vpop.f32.mrb[11].mxu0  ;;  %v1378_v22 = vsub.f32 %v3448_v5, %v1376_v19 }
 0x3a6   : > { %v3689_v23 = vpack.c.bf16 %v3474_v20, %v1621_v1 }
 0x3a7   : > { %v1382_v24 = vsel %vm740_vm1, %v1378_v22, -inf  ;;  %v1379_v25 = vsel %vm740_vm1, %v1377_v21, -inf }
 0x3a8   : > { %1383 = vmax.xlane.f32.xlu0 %v1382_v24  ;;  %1380 = vmax.xlane.f32.xlu1 %v1379_v25 }
 0x3a9   : > { %3691 = vmatprep.subr.msk.bf16.mxu1 %vm3690_vm10, %v3689_v23 }
 0x3aa   : > { %3694 = vmatpush3.bf16.xpose.msk.msra.mxu1 %vm3690_vm10, %v3689_v23 }
 0x3b1   : > { %3480 = vmatmul.mubr.msk.f32.vlgmr.msra.gmra.mrb[6].mxu1 %vm1187_vm2, %v3455_v63 }
 0x3b2   : > { %3486 = vmatprep.mubr.msk.f32.mxu1 %vm740_vm1, %v1731_v26 }
 0x435   : > { %v1381_v27 = vpop.xlane.xlu1 %1380  ;;  %v1384_v28 = vpop.xlane.xlu0 %1383 }
 0x436   : > { %v1385_v29 = vsub.f32 %v1377_v21, %v1381_v27  ;;  %v1386_v31 = vsub.f32 %v1378_v22, %v1384_v28 }
 0x438   : > { %v1387_v32 = vmul.f32 1.442695, %v1385_v29  ;;  %v1389_v33 = vmul.f32 1.442695, %v1386_v31 }
 0x43a   : > { %3916 = vpow2.f32 %v1387_v32 }
 0x43b   : > { %3918 = vpow2.f32 %v1389_v33 }
 0x444   : > { %v3917_v34 = vpop.eup %3916 }
 0x445   : > { %v1391_v35 = vsel %vm740_vm1, %v3917_v34, 0.0  ;;  %v3919_v36 = vpop.eup %3918 }
 0x446   : > { %1392 = vadd.xlane.f32.xlu1 %v1391_v35  ;;  %v1394_v37 = vsel %vm740_vm1, %v3919_v36, 0.0 }
 0x44a   : > { %1395 = vadd.xlane.f32.xlu1 %v1394_v37 }
 0x484   : > { %v3481_v40 = vpop.f32.mrb[6].mxu1 }
 0x485   : > { %v1716_v41 = vadd.f32 %v3481_v40, %v1631_v38  ;;  %v1710_v42 = vpop.f32.mrb[7].mxu1 }
 0x486   : > { %v1711_v43 = vadd.f32 %v1710_v42, %v1630_v39  ;;  %v2197_v42 = vlaneseq }
 0x487   : > { %v1720_v44 = vsub.f32 0.0, %v1716_v41 }
 0x488   : > { %v1719_v45 = vsub.f32 0.0, %v1711_v43 }
 0x489   : > { %v1723_v46 = vmul.f32 1.442695, %v1720_v44  ;;  %v2198_v44 = vshrl.u32 %v2197_v42, 7 }
 0x48a   : > { %v1721_v47 = vmul.f32 1.442695, %v1719_v45  ;;  %v2201_v45 = vand.u32 127, %v2197_v42  ;;  %v2227_v42 = vld [vmem:[%s4836_s12 + $0x38] sm:$0xff] }
 0x48b   : > { %3920 = vpow2.f32 %v1723_v46 }
 0x48c   : > { %3922 = vpow2.f32 %v1721_v47  ;;  %vm2202_vm11 = vcmp.eq.s32.totalorder %v2198_v44, %v2201_v45 }
 0x495   : > { %v3921_v48 = vpop.eup %3920 }
 0x496   : > { %v3923_v49 = vpop.eup %3922  ;;  %v1726_v50 = vadd.f32 1.0, %v3921_v48 }
 0x497   : > { %v1725_v51 = vadd.f32 1.0, %v3923_v49  ;;  %v2209_v49 = vld [vmem:[%s4900_s0 + $0x8] sm:$0xff] }
 0x498   : > { %3924 = vrcp.f32 %v1726_v50 }
 0x499   : > { %3926 = vrcp.f32 %v1725_v51 }
 0x4a2   : > { %v3925_v53 = vpop.eup %3924 }
 0x4a3   : > { %v3927_v54 = vpop.eup %3926 }
 0x4a4   : > { %v3695_v55 = vpack.c.bf16 %v3925_v53, %v3927_v54  ;;  %v2199_v54 = vadd.s32 8, %v2198_v44 }
 0x4a6   : > { %3696 = vmatprep.subr.bf16.mxu1 %v3695_v55  ;;  %vm2203_vm12 = vcmp.eq.s32.totalorder %v2199_v54, %v2201_v45  ;;  %v2771_v45 = vld [vmem:[%s4839_s15 + $0x10] sm:$0xff]  ;;  %v2773_v54 = vld [vmem:[%s4839_s15 + $0x20] sm:$0xff] }
 0x4a7   : > { %3698 = vmatpush3.bf16.msra.mxu1 %v3695_v55 }
 0x4aa   : > { %3487 = vmatmul.mubr.msk.f32.vlgmr.msra.gmra.mrb[8].mxu1 %vm740_vm1, %v1732_v56 }
 0x4ab   : > { %3493 = vmatprep.mubr.msk.f32.mxu1 %vm740_vm1, %v4289_v0 }
 0x4d3   : > { %v1393_v57 = vpop.xlane.xlu1 %1392 }
 0x4d4   : > { %3928 = vrcp.f32 %v1393_v57  ;;  %v2208_v57 = vld [vmem:[%s4900_s0] sm:$0xff] }
 0x4d7   : > { %v1396_v58 = vpop.xlane.xlu1 %1395 }
 0x4d8   : > { %3930 = vrcp.f32 %v1396_v58 }
 0x4de   : > { %v3929_v59 = vpop.eup %3928 }
 0x4df   : > { %v1398_v60 = vmul.f32 %v3929_v59, %v3917_v34  ;;  %v3751_v59 = vpack.c.bf16 %v2209_v49, %v2208_v57 }
 0x4e1   : > { %1401 = vxpose.xlu1.b32.start [1/2] (short) (narrow) %v1398_v60, 16 }
 0x4e2   : > { %v3931_v61 = vpop.eup %3930 }
 0x4e3   : > { %v1400_v63 = vmul.f32 %v3931_v61, %v3919_v36  ;;  %v4511_v61 = vsel %vm2202_vm11, 1.0, %v4080_v30 }
 0x4e5   : > { %1402 = vxpose.xlu1.b32.end [2/2] (short) (narrow) %v1400_v63, 16 }
 0x561   : > { %v1417_v3 = vpop.trf.xlu1 }
 0x562   : > { %1433 = vst.msk [vmem:[%s4462_s30] sm:$0xff] %vm740_vm1, %v1417_v3 }
 0x565   : > { %v1418_v0 = vpop.trf.xlu1 }
 0x566   : > { %1434 = vst.msk [vmem:[%s4462_s30 + $0x8] sm:$0xff] %vm740_vm1, %v1418_v0  ;;  %v3699_v5 = vpack.c.bf16 %v1418_v0, %v1417_v3  ;;  %s4733_s30 = scalar_lea.hbm %s4845_s21, %s3269_s4 }
 0x568   : > { %3700 = vmatprep.subr.bf16.mxu1 %v3699_v5  ;;  %3704 = vmatprep.subr.bf16.mxu0 %v3699_v5 }
 0x569   : > { %3702 = vmatpush3.bf16.msra.mxu1 %v3699_v5  ;;  %3706 = vmatpush3.bf16.msra.mxu0 %v3699_v5 }
 0x56a   : > { %3708 = vmatprep.subr.bf16.mxu1 %v3699_v5  ;;  %3712 = vmatprep.subr.bf16.mxu0 %v3699_v5 }
 0x56c   : > { %3494 = vmatmul.mubr.msk.f32.vlgmr.msra.gmra.mrb[10].mxu1 %vm740_vm1, %v4298_v8  ;;  %3501 = vmatmul.mubr.msk.f32.vlgmr.msra.gmra.mrb[12].mxu0 %vm740_vm1, %v4302_v11 }
 0x56d   : > { %3710 = vmatpush3.bf16.msra.mxu1 %v3699_v5  ;;  %3714 = vmatpush3.bf16.msra.mxu0 %v3699_v5 }
 0x56e   : > { %3507 = vmatprep.mubr.msk.f32.mxu1 %vm740_vm1, %v4293_v2  ;;  %3514 = vmatprep.mubr.msk.f32.mxu0 %vm740_vm1, %v4295_v4 }
 0x570   : > { %3508 = vmatmul.mubr.msk.f32.vlgmr.msra.gmra.mrb[12].mxu1 %vm740_vm1, %v4304_v12  ;;  %3515 = vmatmul.mubr.msk.f32.vlgmr.msra.gmra.mrb[14].mxu0 %vm740_vm1, %v4307_v15 }
 0x57d   : > { %v3488_v6 = vpop.f32.mrb[8].mxu1 }
 0x57e   : > { %v1815_v8 = vsel %vm740_vm1, %v3488_v6, -inf  ;;  %v1805_v7 = vpop.f32.mrb[9].mxu1 }
 0x57f   : > { %v1814_v11 = vsel %vm740_vm1, %v1805_v7, -inf }
 0x580   : > { %v1816_v9 = vmax.f32 %v1814_v11, %v1815_v8 }
 0x582   : > { %v1817_v10 = vrot.slane %v1816_v9, 4 }
 0x584   : > { %v1818_v13 = vmax.f32 %v1816_v9, %v1817_v10  ;;  %v3229_v10 = vld [vmem:[%s4836_s12 + $0x40] sm:$0xff] }
 0x586   : > { %v1819_v14 = vrot.slane %v1818_v13, 2 }
 0x588   : > { %v1820_v2 = vmax.f32 %v1818_v13, %v1819_v14  ;;  %v3230_v13 = vld [vmem:[%s4836_s12 + $0x48] sm:$0xff]  ;;  %v3231_v14 = vld [vmem:[%s4836_s12 + $0x50] sm:$0xff] }
 0x58a   : > { %v1821_v16 = vrot.slane %v1820_v2, 1 }
 0x58c   : > { %v1822_v17 = vmax.f32 %v1820_v2, %v1821_v16  ;;  %v3719_v2 = vpack.c.bf16 %v3230_v13, %v3229_v10  ;;  %v3232_v16 = vld [vmem:[%s4836_s12 + $0x58] sm:$0xff]  ;;  %v2754_v10 = vld [vmem:[%s4838_s14 + $0x8] sm:$0xff]  ;;  %v2755_v13 = vld [vmem:[%s4838_s14 + $0x10] sm:$0xff] }
 0x58e   : > { %v1823_v4 = vsub.f32 %v1805_v7, %v1822_v17  ;;  %v1824_v18 = vsub.f32 %v3488_v6, %v1822_v17  ;;  %v4526_v6 = vsel %vm2203_vm12, 1.0, %v4080_v30  ;;  %v3723_v17 = vpack.c.bf16 %v3232_v16, %v3231_v14  ;;  %3720 = vmatprep.subr.bf16.mxu0 %v3719_v2  ;;  %v2757_v16 = vld [vmem:[%s4838_s14 + $0x20] sm:$0xff] }
 0x58f   : > { %3722 = vmatpush3.bf16.msra.mxu0 %v3719_v2  ;;  %v2756_v2 = vld [vmem:[%s4838_s14 + $0x18] sm:$0xff] }
 0x590   : > { %v1825_v12 = vsel %vm740_vm1, %v1823_v4, -inf  ;;  %v1828_v15 = vsel %vm740_vm1, %v1824_v18, -inf  ;;  %3724 = vmatprep.subr.bf16.mxu0 %v3723_v17 }
 0x591   : > { %1826 = vmax.xlane.f32.xlu0 %v1825_v12 }
 0x593   : > { %3726 = vmatpush3.bf16.msra.mxu0 %v3723_v17  ;;  %v2758_v17 = vld [vmem:[%s4838_s14 + $0x28] sm:$0xff] }
 0x595   : > { %1829 = vmax.xlane.f32.xlu0 %v1828_v15  ;;  %v3235_v15 = vld [vmem:[%s4836_s12 + $0x70] sm:$0xff] }
 0x61e   : > { %v1827_v26 = vpop.xlane.xlu0 %1826 }
 0x61f   : > { %v1831_v27 = vsub.f32 %v1823_v4, %v1827_v26  ;;  %v3233_v4 = vld [vmem:[%s4836_s12 + $0x60] sm:$0xff]  ;;  %v2222_v26 = vld [vmem:[%s4836_s12 + $0x10] sm:$0xff] }
 0x621   : > { %v1833_v29 = vmul.f32 1.442695, %v1831_v27  ;;  %v2223_v27 = vld [vmem:[%s4836_s12 + $0x18] sm:$0xff] }
 0x622   : > { %v1830_v28 = vpop.xlane.xlu0 %1829 }
 0x623   : > { %v1832_v31 = vsub.f32 %v1824_v18, %v1830_v28  ;;  %3932 = vpow2.f32 %v1833_v29  ;;  %v3234_v18 = vld [vmem:[%s4836_s12 + $0x68] sm:$0xff] }
 0x624   : > { %v3727_v12 = vpack.c.bf16 %v3234_v18, %v3233_v4  ;;  %v3799_v4 = vpack.c.bf16 %v2758_v17, %v2757_v16  ;;  %v2759_v18 = vld [vmem:[%s4838_s14 + $0x30] sm:$0xff] }
 0x625   : > { %v1835_v32 = vmul.f32 1.442695, %v1832_v31 }
 0x626   : > { %3728 = vmatprep.subr.bf16.mxu0 %v3727_v12 }
 0x627   : > { %3934 = vpow2.f32 %v1835_v32  ;;  %3730 = vmatpush3.bf16.msra.mxu0 %v3727_v12  ;;  %v3739_v32 = vpack.c.bf16 %v2223_v27, %v2222_v26  ;;  %v2760_v12 = vld [vmem:[%s4838_s14 + $0x38] sm:$0xff] }
 0x62d   : > { %v3933_v33 = vpop.eup %3932 }
 0x62e   : > { %v1837_v34 = vsel %vm740_vm1, %v3933_v33, 0.0 }
 0x631   : > { %v3935_v35 = vpop.eup %3934 }
 0x632   : > { %v1840_v36 = vsel %vm740_vm1, %v3935_v35, 0.0 }
 0x63f   : > { %v3502_v19 = vpop.f32.mrb[12].mxu0  ;;  %v3495_v20 = vpop.f32.mrb[10].mxu1 }
 0x640   : > { %2171 = vrot.lane.b32.xlu0 %v3502_v19, %s4897_s1  ;;  %v1921_v21 = vpop.f32.mrb[11].mxu1  ;;  %v2000_v1 = vpop.f32.mrb[13].mxu0  ;;  %v3236_v19 = vld [vmem:[%s4836_s12 + $0x78] sm:$0xff] }
 0x643   : > { %v3509_v22 = vpop.f32.mrb[12].mxu1  ;;  %v3516_v23 = vpop.f32.mrb[14].mxu0 }
 0x644   : > { %v2079_v24 = vpop.f32.mrb[13].mxu1  ;;  %2169 = vrot.lane.b32.xlu0 %v2000_v1, %s4897_s1  ;;  %v2158_v25 = vpop.f32.mrb[15].mxu0  ;;  %v2221_v1 = vld [vmem:[%s4836_s12 + $0x8] sm:$0xff]  ;;  %s2992_s1 = scalar_lea.sflag [#allocation3], %s4457_s29 }
 0x645   : > { %2177 = vrot.lane.b32.xlu1 %v2079_v24, %s4898_s2  ;;  %v2770_v24 = vld [vmem:[%s4839_s15 + $0x8] sm:$0xff] }
 0x648   : > { %2179 = vrot.lane.b32.xlu0 %v3509_v22, %s4898_s2  ;;  %s4517_s2 = scalar_lea.vmem [#allocation7], %s3178_s26 }
 0x649   : > { %s3013_s24 = sshll.u32 %s4517_s2, 4  ;;  %s4720_s24 = int_to_ptr.vmem [resolvable:$true] %s3013_s24 }
 0x64c   : > { %2185 = vrot.lane.b32.xlu0 %v2158_v25, %s4899_s22 }
 0x66b   : > { %1838 = vadd.xlane.f32.xlu0 %v1837_v34  ;;  %v2224_v34 = vld [vmem:[%s4836_s12 + $0x20] sm:$0xff] }
 0x66f   : > { %1841 = vadd.xlane.f32.xlu0 %v1840_v36 }
 0x685   : > { %2187 = vrot.lane.b32.xlu0 %v3516_v23, %s4899_s22  ;;  %v2769_v23 = vld [vmem:[%s4839_s15] sm:$0xff] }
 0x686   : > { %v3775_v25 = vpack.c.bf16 %v2770_v24, %v2769_v23  ;;  %v2765_v24 = vld [vmem:[%s4838_s14 + $0x60] sm:$0xff] }
 0x6b2   : > { %v2172_v37 = vpop.permute.xlu0 %2171 }
 0x6b3   : > { %v2192_v48 = vsel %vm740_vm1, %v3495_v20, %v2172_v37  ;;  %v3731_v20 = vpack.c.bf16 %v3236_v19, %v3235_v15  ;;  %v3803_v15 = vpack.c.bf16 %v2760_v12, %v2759_v18  ;;  %v2761_v19 = vld [vmem:[%s4838_s14 + $0x40] sm:$0xff] }
 0x6b5   : > { %3732 = vmatprep.subr.bf16.mxu0 %v3731_v20 }
 0x6b6   : > { %v2170_v38 = vpop.permute.xlu0 %2169  ;;  %3734 = vmatpush3.bf16.msra.mxu0 %v3731_v20  ;;  %v2762_v20 = vld [vmem:[%s4838_s14 + $0x48] sm:$0xff] }
 0x6b7   : > { %v2191_v46 = vsel %vm740_vm1, %v1921_v21, %v2170_v38  ;;  %v2178_v47 = vpop.permute.xlu1 %2177  ;;  %v2220_v21 = vld [vmem:[%s4836_s12] sm:$0xff] }
 0x6b8   : > { %v2193_v50 = vsel %vm743_vm7, %v2191_v46, %v2178_v47  ;;  %v3735_v22 = vpack.c.bf16 %v2221_v1, %v2220_v21  ;;  %v2772_v46 = vld [vmem:[%s4839_s15 + $0x18] sm:$0xff]  ;;  %v3807_v21 = vpack.c.bf16 %v2762_v20, %v2761_v19  ;;  %v2763_v1 = vld [vmem:[%s4838_s14 + $0x50] sm:$0xff] }
 0x6ba   : > { %v2180_v39 = vpop.permute.xlu0 %2179  ;;  %3736 = vmatprep.subr.bf16.mxu0 %v3735_v22 }
 0x6bb   : > { %v2194_v51 = vsel %vm743_vm7, %v2192_v48, %v2180_v39 }
 0x6be   : > { %v2186_v40 = vpop.permute.xlu0 %2185 }
 0x6bf   : > { %v4500_v55 = vsel %vm746_vm8, %v2193_v50, %v2186_v40  ;;  %v3246_v50 = vld [vmem:[%s4836_s12 + $0x88] sm:$0xff] }
 0x6f8   : > { %v1839_v41 = vpop.xlane.xlu0 %1838 }
 0x6f9   : > { %3936 = vrcp.f32 %v1839_v41  ;;  %v2226_v41 = vld [vmem:[%s4836_s12 + $0x30] sm:$0xff] }
 0x6fa   : > { %v3747_v47 = vpack.c.bf16 %v2227_v42, %v2226_v41 }
 0x6fc   : > { %v1842_v43 = vpop.xlane.xlu0 %1841 }
 0x6fd   : > { %3938 = vrcp.f32 %v1842_v43 }
 0x700   : > { %v2188_v53 = vpop.permute.xlu0 %2187 }
 0x701   : > { %v4503_v56 = vsel %vm746_vm8, %v2194_v51, %v2188_v53  ;;  %v3779_v53 = vpack.c.bf16 %v2772_v46, %v2771_v45 }
 0x702   : > { %v3715_v58 = vpack.c.bf16 %v4503_v56, %v4500_v55 }
 0x703   : > { %v3937_v60 = vpop.eup %3936 }
 0x704   : > { %v4513_v63 = vmul.f32 %v3937_v60, %v3933_v33  ;;  %3716 = vmatprep.subr.bf16.mxu1 %v3715_v58  ;;  %v3248_v60 = vld [vmem:[%s4836_s12 + $0x98] sm:$0xff] }
 0x705   : > { %3718 = vmatpush3.bf16.msra.mxu1 %v3715_v58 }
 0x706   : > { %1847 = vst.msk [vmem:[%s4517_s2] sm:$0xff] %vm740_vm1, %v4513_v63  ;;  %v2228_v3 = vmul.f32 %v2208_v57, %v4513_v63  ;;  %v2210_v0 = vmul.f32 %v4511_v61, %v4513_v63  ;;  %3752 = vmatprep.subr.bf16.mxu1 %v3751_v59 }
 0x707   : > { %v3939_v5 = vpop.eup %3938 }
 0x708   : > { %v4528_v8 = vmul.f32 %v3939_v5, %v3935_v35  ;;  %3521 = vmatprep.mubr.msk.f32.mxu1 %vm740_vm1, %v2228_v3  ;;  %v2212_v7 = vsel %vm740_vm1, %v2210_v0, 0.0  ;;  %v2225_v35 = vld [vmem:[%s4836_s12 + $0x28] sm:$0xff]  ;;  %v2776_v3 = vld [vmem:[%s4839_s15 + $0x38] sm:$0xff]  ;;  %v3249_v5 = vld [vmem:[%s4836_s12 + $0xa0] sm:$0xff] }
 0x709   : > { %2213 = vadd.xlane.f32.xlu0 %v2212_v7  ;;  %v3743_v39 = vpack.c.bf16 %v2225_v35, %v2224_v34 }
 0x70a   : > { %1848 = vst.msk [vmem:[%s4517_s2 + $0x8] sm:$0xff] %vm740_vm1, %v4528_v8  ;;  %v2229_v11 = vmul.f32 %v2209_v49, %v4528_v8  ;;  %v2211_v9 = vmul.f32 %v4526_v6, %v4528_v8 }
 0x70c   : > { %3522 = vmatmul.mubr.msk.f32.vlgmr.msra.gmra.mrb[14].mxu1 %vm740_vm1, %v2229_v11  ;;  %v2215_v30 = vsel %vm740_vm1, %v2211_v9, 0.0  ;;  %v3252_v11 = vld [vmem:[%s4836_s12 + $0xb8] sm:$0xff] }
 0x70d   : > { %3754 = vmatpush3.bf16.msra.mxu1 %v3751_v59  ;;  %2216 = vadd.xlane.f32.xlu1 %v2215_v30  ;;  %v3247_v59 = vld [vmem:[%s4836_s12 + $0x90] sm:$0xff]  ;;  %v2753_v30 = vld [vmem:[%s4838_s14] sm:$0xff] }
 0x70e   : > { %3756 = vmatprep.subr.bf16.mxu1 %v3715_v58  ;;  %3566 = vmatprep.mubr.msk.f32.mxu1 %vm740_vm1, %v2208_v57  ;;  %v3763_v0 = vpack.c.bf16 %v3248_v60, %v3247_v59  ;;  %v3791_v14 = vpack.c.bf16 %v2754_v10, %v2753_v30 }
 0x710   : > { %3567 = vmatmul.mubr.msk.f32.vlgmr.msra.gmra.mrb[16].mxu1 %vm740_vm1, %v2209_v49  ;;  %v3245_v49 = vld [vmem:[%s4836_s12 + $0x80] sm:$0xff] }
 0x711   : > { %3758 = vmatpush3.bf16.msra.mxu1 %v3715_v58  ;;  %v3759_v57 = vpack.c.bf16 %v3246_v50, %v3245_v49 }
 0x712   : > { %3776 = vmatprep.subr.bf16.mxu1 %v3775_v25 }
 0x796   : > { %v2214_v28 = vpop.xlane.xlu0 %2213 }
 0x797   : > { %v2218_v33 = vmul.f32 %v2214_v28, %v4500_v55  ;;  %v2774_v55 = vld [vmem:[%s4839_s15 + $0x28] sm:$0xff] }
 0x79a   : > { %v2217_v58 = vpop.xlane.xlu1 %2216 }
 0x7df   : > { %v3523_v29 = vpop.f32.mrb[14].mxu1 }
 0x7e0   : > { %v2302_v31 = vpop.f32.mrb[15].mxu1 }
 0x7e1   : > { %3540 = vmatprep.mubr.msk.f32.mxu0 %vm1548_vm9, %v2302_v31  ;;  %v2768_v31 = vld [vmem:[%s4838_s14 + $0x78] sm:$0xff] }
 0x7e2   : > { %3541 = vmatmul.mubr.msk.f32.vlgmr.msra.gmra.mrb[16].mxu0 %vm1548_vm9, %v3523_v29  ;;  %v2767_v29 = vld [vmem:[%s4838_s14 + $0x70] sm:$0xff] }
 0x7e3   : > { %3738 = vmatpush3.bf16.msra.mxu0 %v3735_v22  ;;  %3559 = vmatprep.mubr.msk.f32.mxu0 %vm1548_vm9, %v2218_v33  ;;  %v3568_v36 = vpop.f32.mrb[16].mxu1  ;;  %v2764_v22 = vld [vmem:[%s4838_s14 + $0x58] sm:$0xff]  ;;  %v3255_v33 = vld [vmem:[%s4837_s13] ss:$0 sm:$0xff] }
 0x7e4   : > { %v2564_v37 = vmul.f32 2.0, %v3568_v36  ;;  %v2554_v38 = vpop.f32.mrb[17].mxu1  ;;  %3740 = vmatprep.subr.bf16.mxu0 %v3739_v32  ;;  %v3811_v23 = vpack.c.bf16 %v2764_v22, %v2763_v1 }
 0x7e5   : > { %v2563_v40 = vmul.f32 2.0, %v2554_v38 }
 0x7e6   : > { %v2566_v43 = vsub.f32 %v2564_v37, %v4526_v6  ;;  %v3250_v6 = vld [vmem:[%s4836_s12 + $0xa8] sm:$0xff] }
 0x7e7   : > { %v2565_v44 = vsub.f32 %v2563_v40, %v4511_v61  ;;  %3742 = vmatpush3.bf16.msra.mxu0 %v3739_v32  ;;  %v3783_v61 = vpack.c.bf16 %v2774_v55, %v2773_v54  ;;  %v3767_v7 = vpack.c.bf16 %v3250_v6, %v3249_v5  ;;  %v3819_v32 = vpack.c.bf16 %v2768_v31, %v2767_v29  ;;  %v3258_v40 = vld [vmem:[%s4840_s16] ss:$0 sm:$0xff] }
 0x7e8   : > { %3744 = vmatprep.subr.bf16.mxu0 %v3743_v39  ;;  %v2568_v51 = vmul.f32 %v2566_v43, %v4528_v8 }
 0x7e9   : > { %v2567_v48 = vmul.f32 %v2565_v44, %v4513_v63  ;;  %v2775_v63 = vld [vmem:[%s4839_s15 + $0x30] sm:$0xff] }
 0x7ea   : > { %v3787_v8 = vpack.c.bf16 %v2776_v3, %v2775_v63 }
 0x7eb   : > { %3746 = vmatpush3.bf16.msra.mxu0 %v3743_v39  ;;  %3573 = vmatprep.mubr.msk.f32.mxu1 %vm740_vm1, %v2567_v48 }
 0x7ec   : > { %3574 = vmatmul.mubr.msk.f32.vlgmr.msra.gmra.mrb[18].mxu1 %vm740_vm1, %v2568_v51  ;;  %3748 = vmatprep.subr.bf16.mxu0 %v3747_v47 }
 0x7ed   : > { %3778 = vmatpush3.bf16.msra.mxu1 %v3775_v25  ;;  %3611 = vmatprep.mubr.msk.f32.mxu1 %vm1548_vm9, %v4403_v52  ;;  %v2219_v52 = vmul.f32 %v2217_v58, %v4503_v56  ;;  %v3251_v56 = vld [vmem:[%s4836_s12 + $0xb0] sm:$0xff]  ;;  %v2766_v25 = vld [vmem:[%s4838_s14 + $0x68] sm:$0xff] }
 0x7ee   : > { %3780 = vmatprep.subr.bf16.mxu1 %v3779_v53  ;;  %v3771_v9 = vpack.c.bf16 %v3252_v11, %v3251_v56  ;;  %v3815_v26 = vpack.c.bf16 %v2766_v25, %v2765_v24 }
 0x7ef   : > { %3750 = vmatpush3.bf16.msra.mxu0 %v3747_v47 }
 0x7f0   : > { %3760 = vmatprep.subr.bf16.mxu0 %v3759_v57 }
 0x7f1   : > { %3782 = vmatpush3.bf16.msra.mxu1 %v3779_v53 }
 0x7f2   : > { %3560 = vmatmul.mubr.msk.f32.vlgmr.msra.gmra.mrb[16].mxu0 %vm1548_vm9, %v2219_v52  ;;  %3784 = vmatprep.subr.bf16.mxu1 %v3783_v61 }
 0x7f3   : > { %3762 = vmatpush3.bf16.msra.mxu0 %v3759_v57 }
 0x7f4   : > { %3764 = vmatprep.subr.bf16.mxu0 %v3763_v0 }
 0x7f5   : > { %3786 = vmatpush3.bf16.msra.mxu1 %v3783_v61 }
 0x7f6   : > { %3788 = vmatprep.subr.bf16.mxu1 %v3787_v8 }
 0x7f7   : > { %3766 = vmatpush3.bf16.msra.mxu0 %v3763_v0 }
 0x7f8   : > { %3768 = vmatprep.subr.bf16.mxu0 %v3767_v7 }
 0x7f9   : > { %3790 = vmatpush3.bf16.msra.mxu1 %v3787_v8 }
 0x7fa   : > { %3792 = vmatprep.subr.bf16.mxu1 %v3791_v14 }
 0x7fb   : > { %3770 = vmatpush3.bf16.msra.mxu0 %v3767_v7 }
 0x7fc   : > { %3612 = vmatmul.mubr.msk.f32.vlgmr.msra.gmra.mrb[20].mxu1 %vm1548_vm9, %v4424_v62  ;;  %3772 = vmatprep.subr.bf16.mxu0 %v3771_v9  ;;  %v3795_v62 = vpack.c.bf16 %v2756_v2, %v2755_v13 }
 0x7fd   : > { %3794 = vmatpush3.bf16.msra.mxu1 %v3791_v14 }
 0x7fe   : > { %3796 = vmatprep.subr.bf16.mxu1 %v3795_v62 }
 0x7ff   : > { %3774 = vmatpush3.bf16.msra.mxu0 %v3771_v9 }
 0x801   : > { %3798 = vmatpush3.bf16.msra.mxu1 %v3795_v62 }
 0x802   : > { %3800 = vmatprep.subr.bf16.mxu1 %v3799_v4 }
 0x805   : > { %3802 = vmatpush3.bf16.msra.mxu1 %v3799_v4 }
 0x806   : > { %3804 = vmatprep.subr.bf16.mxu1 %v3803_v15 }
 0x809   : > { %3806 = vmatpush3.bf16.msra.mxu1 %v3803_v15 }
 0x80a   : > { %3808 = vmatprep.subr.bf16.mxu1 %v3807_v21 }
 0x80d   : > { %3810 = vmatpush3.bf16.msra.mxu1 %v3807_v21 }
 0x80e   : > { %3812 = vmatprep.subr.bf16.mxu1 %v3811_v23 }
 0x811   : > { %3814 = vmatpush3.bf16.msra.mxu1 %v3811_v23 }
 0x812   : > { %3816 = vmatprep.subr.bf16.mxu1 %v3815_v26 }
 0x815   : > { %3818 = vmatpush3.bf16.msra.mxu1 %v3815_v26 }
 0x816   : > { %3820 = vmatprep.subr.bf16.mxu1 %v3819_v32 }
 0x819   : > { %3822 = vmatpush3.bf16.msra.mxu1 %v3819_v32 }
 0x8bf   : > { %v3575_v27 = vpop.f32.mrb[18].mxu1 }
 0x8c0   : > { %v2641_v28 = vpop.f32.mrb[19].mxu1 }
 0x8c1   : > { %3592 = vmatprep.mubr.msk.f32.mxu0 %vm1548_vm9, %v2641_v28 }
 0x8c2   : > { %3593 = vmatmul.mubr.msk.f32.vlgmr.msra.gmra.mrb[16].mxu0 %vm1548_vm9, %v3575_v27 }
 0x995   : > { %v3594_v34 = vpop.f32.mrb[16].mxu0 }
 0x996   : > { %v2750_v35 = vadd.f32 %v3594_v34, %v3255_v33  ;;  %v2731_v36 = vpop.f32.mrb[17].mxu0 }
 0x997   : > { %v2749_v37 = vadd.f32 %v3255_v33, %v2731_v36 }
 0x998   : > { %v2752_v39 = vmax.f32 %v2750_v35, 0.0 }
 0x999   : > { %v2751_v38 = vmax.f32 %v2749_v37, 0.0 }
 0x99b   : > { %3646 = vmatprep.mubr.f32.mxu1 %v2751_v38 }
 0x99c   : > { %3647 = vmatmul.mubr.f32.vlgmr.msra.gmra.mrb[20].mxu1 %v2752_v39 }
 0xa6f   : > { %v3648_v41 = vpop.f32.mrb[20].mxu1 }
 0xa70   : > { %v2935_v42 = vadd.f32 %v3648_v41, %v3258_v40  ;;  %v2918_v43 = vpop.f32.mrb[21].mxu1 }
 0xa71   : > { %v2934_v44 = vadd.f32 %v3258_v40, %v2918_v43 }
 0xa72   : > { %v2937_v45 = vmax.f32 %v2935_v42, 0.0 }
 0xa73   : > { %v2936_v46 = vmax.f32 %v2934_v44, 0.0 }
 0xa75   : > { %v2938_v47 = vadd.f32 %v2937_v45, %v2936_v46 }
 0xa77   : > { %2939 = vadd.xlane.f32.xlu0 %v2938_v47 }
 0xb04   : > { %v2940_v48 = vpop.xlane.xlu0 %2939 }
 0xb05   : > { %v2941_v49 = vrot.slane %v2940_v48, 4 }
 0xb07   : > { %v2942_v50 = vadd.f32 %v2941_v49, %v2940_v48 }
 0xb09   : > { %v2943_v51 = vrot.slane %v2942_v50, 2 }
 0xb0b   : > { %v2944_v53 = vadd.f32 %v2943_v51, %v2942_v50 }
 0xb0d   : > { %v2945_v54 = vrot.slane %v2944_v53, 1 }
 0xb0f   : > { %v2946_v55 = vadd.f32 %v2945_v54, %v2944_v53 }
 0xb11   : > { %3829 = vpush %v2946_v55 }
 0xb42   : > { %s3830_s26 = spop %3829 }
 0xb43   : > { %s2950_s22 = smul.f32 0.00048828125, %s3830_s26  ;;  %s3972_s26 = scalar_lea.vmem %s4720_s24, 256 }
 0xb44   : > { %p3973_p10 = scmp.ne.s32.totalorder %s4720_s24, %s3972_s26 }
 0xb45   : > { %v2951_v57 = vstv %s2950_s22  ;;  %s4084_s22 = smov [#allocation7]  }
 0xb46   : > { %v4710_v58 = vsub.f32 %v2936_v46, %v2951_v57  ;;  %v4712_v59 = vsub.f32 %v2937_v45, %v2951_v57  ;;  %p3974_p0 = pnand %p3973_p10, %p4901_p12  ;;  %s3976_s9 = sshll.u32 %s4084_s22, 4  ;;  %s3977_s9 = int_to_ptr.vmem [resolvable:$false] %s3976_s9 }
 0xb47   : > { %s3978_s3 = scalar_lea.vmem %s3977_s9, 512  ;;  %p3979_p8 = scmp.lt.s32.totalorder %s4720_s24, %s3977_s9 }
 0xb48   : > { %v2954_v60 = vmul.f32 %v4710_v58, %v4710_v58  ;;  %v2955_v61 = vmul.f32 %v4712_v59, %v4712_v59  ;;  %p3975_p7 = pneg %p3974_p0  ;;  %p3980_p11 = scmp.lt.s32.totalorder %s3978_s3, %s3972_s26 }
 0xb4a   : > { %v2956_v63 = vadd.f32 %v2955_v61, %v2954_v60  ;;  %p3981_p13 = por %p3980_p11, %p3979_p8 }
 0xb4c   : > { %2957 = vadd.xlane.f32.xlu0 %v2956_v63  ;;  %p3982_p1 = pnand %p3981_p13, %p3975_p7 }
 0xbd9   : > { %v2958_v3 = vpop.xlane.xlu0 %2957 }
 0xbda   : > { %v2959_v52 = vrot.slane %v2958_v3, 4 }
 0xbdc   : > { %v2960_v0 = vadd.f32 %v2959_v52, %v2958_v3 }
 0xbde   : > { %v2961_v5 = vrot.slane %v2960_v0, 2 }
 0xbe0   : > { %v2962_v6 = vadd.f32 %v2961_v5, %v2960_v0 }
 0xbe2   : > { %v2963_v8 = vrot.slane %v2962_v6, 1 }
 0xbe3   : > { %3985 = shalt.err (!%p3982_p1)
}
 0xbe4   : > { %s3986_s4 = scalar_lea.hbm %s4728_s8, 256  ;;  %s3990_s0 = scalar_lea.hbm %s4844_s20, 512 }
 0xbe5   : > { %p3987_p2 = scmp.ne.s32.totalorder %s4728_s8, %s3986_s4  ;;  %p3991_p9 = scmp.lt.u32.totalorder %s4728_s8, %s4844_s20 }
 0xbe6   : > { %p3992_p5 = scmp.lt.u32.totalorder %s3990_s0, %s3986_s4  ;;  %p3994_p10 = scmp.lt.u32.totalorder %s3986_s4, %s4728_s8 }
 0xbe7   : > { %p3988_p3 = pnand %p3987_p2, %p4901_p12 }
 0xbe8   : > { %p3993_p6 = por %p3992_p5, %p3991_p9 }
 0xbe9   : > { %p3989_p4 = pneg %p3988_p3 }
 0xbea   : > { %p3995_p0 = por %p3994_p10, %p3993_p6 }
 0xbec   : > { %p3996_p7 = pnand %p3995_p0, %p3989_p4 }
 0xbee   : > { %3999 = shalt.err (!%p3996_p7)
}
 0xbef   : > { %s4085_s26 = smov 128   ;;  %s4086_s22 = smov 8   ;;  %v2964_v7 = vadd.f32 %v2963_v8, %v2962_v6 }
 0xbf0   : > { %3843 = dma.vmem_to_hbm [thread:$0]  (%p4901_p12), %s4720_s24, 256, %s4728_s8, %s2992_s1, %s4085_s26, %s4085_s26, %s4086_s22  }
 0xbf1   : > { %s2997_s3 = scalar_lea.sflag [#allocation9], %s4457_s29  ;;  %s4000_s4 = scalar_lea.vmem %s4722_s28, 256 }
 0xbf2   : > { %p4001_p8 = scmp.ne.s32.totalorder %s4722_s28, %s4000_s4  ;;  %s4087_s6 = smov [#allocation8]  }
 0xbf3   : > { %s4004_s7 = sshll.u32 %s4087_s6, 4  ;;  %s4005_s7 = int_to_ptr.vmem [resolvable:$false] %s4004_s7 }
 0xbf4   : > { %p4002_p11 = pnand %p4001_p8, %p4901_p12  ;;  %s4006_s0 = scalar_lea.vmem %s4005_s7, 512 }
 0xbf5   : > { %p4007_p1 = scmp.lt.s32.totalorder %s4722_s28, %s4005_s7  ;;  %p4008_p2 = scmp.lt.s32.totalorder %s4006_s0, %s4000_s4 }
 0xbf6   : > { %p4003_p13 = pneg %p4002_p11 }
 0xbf7   : > { %p4009_p3 = por %p4008_p2, %p4007_p1 }
 0xbf9   : > { %p4010_p4 = pnand %p4009_p3, %p4003_p13 }
 0xbfb   : > { %4013 = shalt.err (!%p4010_p4)
}
 0xbfc   : > { %s4014_s24 = scalar_lea.hbm %s4733_s30, 256  ;;  %s4018_s2 = scalar_lea.hbm %s4845_s21, 512 }
 0xbfd   : > { %p4015_p9 = scmp.ne.s32.totalorder %s4733_s30, %s4014_s24  ;;  %p4019_p10 = scmp.lt.u32.totalorder %s4733_s30, %s4845_s21 }
 0xbfe   : > { %p4020_p0 = scmp.lt.u32.totalorder %s4018_s2, %s4014_s24  ;;  %p4022_p8 = scmp.lt.u32.totalorder %s4014_s24, %s4733_s30 }
 0xbff   : > { %p4016_p5 = pnand %p4015_p9, %p4901_p12 }
 0xc00   : > { %p4021_p7 = por %p4020_p0, %p4019_p10 }
 0xc01   : > { %p4017_p6 = pneg %p4016_p5 }
 0xc02   : > { %p4023_p11 = por %p4022_p8, %p4021_p7 }
 0xc04   : > { %p4024_p13 = pnand %p4023_p11, %p4017_p6 }
 0xc06   : > { %4027 = shalt.err (!%p4024_p13)
}
 0xc07   : > { %3844 = dma.vmem_to_hbm [thread:$0]  (%p4901_p12), %s4722_s28, 256, %s4733_s30, %s2997_s3, %s4085_s26, %s4085_s26, %s4086_s22   ;;  %3831 = vpush %v2964_v7 }
 0xc08   : > { %v2976_v30 = vld [vmem:[%s4841_s17] sm:$0xff]  ;;  %v2977_v10 = vld [vmem:[%s4841_s17 + $0x8] sm:$0xff]  ;;  %s3268_s2 = sshll.u32 %s4283_s23, 4 }
 0xc09   : > { %v2980_v2 = vld [vmem:[%s4842_s18] sm:$0xff]  ;;  %v2981_v62 = vld [vmem:[%s4842_s18 + $0x8] sm:$0xff]  ;;  %s704_s6 = scalar_lea.vmem %s4843_s19, %s3268_s2 }
 0xc38   : > { %s3832_s4 = spop %3831 }
 0xc39   : > { %s2968_s7 = smul.f32 0.00048828125, %s3832_s4 }
 0xc3b   : > { %s2969_s0 = sadd.f32 1e-05, %s2968_s7 }
 0xc3d   : > { %v2970_v56 = vstv %s2969_s0 }
 0xc3e   : > { %3940 = vrsqrt.f32 %v2970_v56 }
 0xc48   : > { %v3941_v11 = vpop.eup %3940 }
 0xc49   : > { %3833 = vpush %v3941_v11 }
 0xc7a   : > { %s3834_s24 = spop %3833 }
 0xc7b   : > { %v2973_v9 = vstv %s3834_s24 }
 0xc7c   : > { %v2974_v13 = vmul.f32 %v2973_v9, %v4710_v58  ;;  %v2975_v14 = vmul.f32 %v2973_v9, %v4712_v59 }
 0xc7e   : > { %v2978_v16 = vmul.f32 %v2976_v30, %v2974_v13  ;;  %v2979_v17 = vmul.f32 %v2977_v10, %v2975_v14 }
 0xc80   : > { %v2982_v4 = vadd.f32 %v2980_v2, %v2978_v16  ;;  %v2983_v18 = vadd.f32 %v2981_v62, %v2979_v17 }
 0xc82   : > { %2984 = vst [vmem:[%s704_s6] sm:$0xff] %v2982_v4  ;;  %2985 = vst [vmem:[%s704_s6 + $0x8] sm:$0xff] %v2983_v18 }
 0xc83 PF: > { %s4902_s23 = sld [smem:[#allocation14_spill]]  ;;  %s4903_s4 = sld [smem:[#allocation18_spill]] }
 0xc84   : > { %p3865_p12 = scmp.ge.s32.totalorder %s4074_s27, 2 }
 0xc89   : > { %s3052_s7 = sand.u32 1, %s4902_s23   ;;  %p4904_p1 = scmp.ne.s32.totalorder %s4903_s4, 0 }
 0xc8a   : > { %s3053_s0 = scalar_lea.sflag [#allocation3], %s3052_s7 }
 0xc8b   : > { %p3855_p2 = pnand %p3865_p12, %p4904_p1 }
 0xc8d   : > { %4053 = dma.done.wait (!%p3855_p2), %s3053_s0, 256  }
 0xc8e   : > { %4055 = vsyncadd (!%p3855_p2), %s3053_s0, 4294967040  ;;  %s3062_s24 = scalar_lea.sflag [#allocation9], %s3052_s7 }
 0xc8f   : > { %4057 = dma.done.wait (!%p3855_p2), %s3062_s24, 256  }
 0xc90   : > { %4059 = vsyncadd (!%p3855_p2), %s3062_s24, 4294967040  ;;  %s4905_s27 = sld [smem:[#allocation16_spill]]  ;;  %s4906_s5 = sld [smem:[#allocation15_spill]] }
 0xc91   : > { %s4907_s26 = sld [smem:[#allocation17_spill]]  ;;  %s4908_s2 = smov %s4066_s25 }
 0xc96   : > { %p37_p3 = scmp.ge.s32.totalorder %s4905_s27, 4   ;;  %s4909_s25 = smov %s4906_s5 }
 0xc98   :  { %39 = sbr.rel (!%p37_p3) target bundleno = 18 (0x12), region = 174 }
 0xc9f   :  { %3067 = vsyncpa [#allocation3], 1 }
 0xca0   :  { %3069 = vsyncpa [#allocation3 + $0x1], 1 }
 0xca1   :  { %3070 = vsyncpa [#allocation9], 1 }
 0xca2   :  { %3072 = vsyncpa [#allocation9 + $0x1], 1 }
 0xca3   :  { %3073 = vsyncpa [#allocation4], 1 }
 0xca4   :  { %3075 = vsyncpa [#allocation4 + $0x1], 1 }
 0xca5   :  { %3076 = vsyncpa [#allocation6], 1 }

</bundles_post_ra>
